<compile_context>
chip_gen: v7x
topology: tpu7x:2x2x1
jax: 0.10.0
libtpu: 0.0.40
codegen_flags: <defaults>
</compile_context>

<pallas_src>
import math
from functools import partial

import jax
import jax.numpy as jnp
from jax import lax
from jax.experimental import pallas as pl
from jax.experimental.pallas import tpu as pltpu


# ----------------------------- Kernel body ---------------------------------

def _mha_kernel(x_ref, wq_ref, bq_ref, wk_ref, bk_ref, wv_ref, bv_ref,
                wo_ref, bo_ref, score_ref, out_ref,
                q_all, k_all, v_all, acc_ref,
                *, h, dq, dv, apply_mask, compute_dtype, approx_recip):
    # x_ref:     (1, T, D)                     (resident across the head axis)
    # wq_ref:    (D, h*dq)   bq_ref: (1, h*dq) (constant, single-buffered)
    # wk_ref:    (D, h*dq)   bk_ref: (1, h*dq)
    # wv_ref:    (D, h*dv)   bv_ref: (1, h*dv)
    # wo_ref:    (dv, D)  -- per-head slice of W_o      bo_ref: (1, D)
    # score_ref: (1, 1, T, T)   out_ref: (1, T, D)
    # q_all/k_all: (h, T, dq)  v_all: (h, T, dv)  acc_ref: (T, D) f32   (VMEM scratch)
    hi = pl.program_id(1)
    T = x_ref.shape[1]

    @pl.when(hi == 0)
    def _project_all_heads():
        # One wide GEMM per projection (fills MXU lanes), f32 accumulation, then a
        # static per-head split into head-major scratch (cheap leading-dim indexing
        # later; avoids dynamic lane-dim slicing).
        x = x_ref[0].astype(compute_dtype)                          # (T, D)

        def proj(w_ref, b_ref):
            return (jnp.dot(x, w_ref[...].astype(compute_dtype),
                            preferred_element_type=jnp.float32) + b_ref[...])

        # Fold 1/sqrt(dq) into Q once, in f32, before any compute_dtype rounding.
        q = proj(wq_ref, bq_ref) * jnp.float32(1.0 / math.sqrt(dq))  # (T, h*dq)
        k = proj(wk_ref, bk_ref)                                     # (T, h*dq)
        v = proj(wv_ref, bv_ref)                                     # (T, h*dv)

        for j in range(h):                                           # static, h small
            q_all[j] = q[:, j * dq:(j + 1) * dq].astype(q_all.dtype)
            k_all[j] = k[:, j * dq:(j + 1) * dq].astype(k_all.dtype)
            v_all[j] = v[:, j * dv:(j + 1) * dv].astype(v_all.dtype)

        acc_ref[...] = jnp.zeros_like(acc_ref)

    # ---- per-head attention (one head per grid step) ----
    qh = q_all[hi]                                                   # (T, dq)
    kh = k_all[hi]                                                   # (T, dq)
    vh = v_all[hi]                                                   # (T, dv)

    # Contract last dims directly -- no explicit K transpose.
    s = lax.dot_general(qh, kh, (((1,), (1,)), ((), ())),
                        preferred_element_type=jnp.float32)          # (T, T) f32

    # self.score in the PyTorch module is the *pre-mask, pre-softmax* score.
    score_ref[0, 0] = s.astype(score_ref.dtype)

    if apply_mask:  # mask=True and stage == 'train'
        row = lax.broadcasted_iota(jnp.int32, (T, T), 0)
        col = lax.broadcasted_iota(jnp.int32, (T, T), 1)
        s = jnp.where(col <= row, s, jnp.float32(-2 ** 32 + 1))

    # Numerically-stable softmax in f32; reciprocal on the EUP when approx_recip.
    s = s - jnp.max(s, axis=-1, keepdims=True)
    p = jnp.exp(s)
    p = p * pl.reciprocal(jnp.sum(p, axis=-1, keepdims=True), approx=approx_recip)

    # Per-head output, immediately folded through this head's W_o slice and
    # accumulated in f32 -- no head_outs list, no concatenate, bounded live set.
    head = jnp.dot(p.astype(compute_dtype), vh,
                   preferred_element_type=jnp.float32)               # (T, dv) f32
    acc_ref[...] += jnp.dot(head.astype(compute_dtype),
                            wo_ref[...].astype(compute_dtype),
                            preferred_element_type=jnp.float32)      # (T, D) f32

    @pl.when(hi == pl.num_programs(1) - 1)
    def _store_output():
        out_ref[0] = (acc_ref[...] + bo_ref[...]).astype(out_ref.dtype)


# ----------------------------- VMEM budget ----------------------------------

def _round_up(x, m):
    return (x + m - 1) // m * m


def _padded_bytes(rows, cols, itemsize):
    # (8, 128) tile padding (upper bound; sub-32-bit dtypes pack along sublanes).
    return _round_up(max(rows, 1), 8) * _round_up(max(cols, 1), 128) * itemsize


def _vmem_limit_bytes(T, D, h, dq, dv, compute_dtype, score_dtype):
    cd = jnp.dtype(compute_dtype).itemsize
    sd = jnp.dtype(score_dtype).itemsize
    needed = (
        2 * _padded_bytes(T, D, 4)                  # x block (double-buffered)
        + 2 * _padded_bytes(T, T, sd)               # one head's score block
        + 2 * _padded_bytes(T, D, 4)                # output block
        + 2 * _padded_bytes(D, h * dq, 4)           # W_q, W_k (single-buffered)
        + _padded_bytes(D, h * dv, 4)               # W_v
        + 2 * _padded_bytes(dv, D, 4)               # per-head W_o slice (double-buf)
        + 2 * _padded_bytes(1, h * dq, 4)
        + _padded_bytes(1, h * dv, 4)
        + _padded_bytes(1, D, 4)                    # biases
        + 2 * h * _padded_bytes(T, dq, cd)          # q_all, k_all scratch
        + h * _padded_bytes(T, dv, cd)              # v_all scratch
        + _padded_bytes(T, D, 4)                    # output accumulator scratch
    )
    needed = int(needed * 1.25) + (4 << 20)         # headroom for live temporaries
    try:
        cap = int(pltpu.get_tpu_info().vmem_capacity_bytes)
    except Exception:
        cap = 64 * 2 ** 20                          # assume the smallest (v7x) part
    # Allow up to 75% of physical VMEM (~96 MiB on v5e/v6e, ~48 MiB on v7x).
    return int(min(max(needed, 32 * 2 ** 20), (cap * 3) // 4))


# ----------------------------- Wrapper --------------------------------------

def multi_head_attention(x, params, *, h, dq, dv, stage="test", mask=False,
                         compute_dtype=jnp.bfloat16, score_dtype=jnp.float32):
    """Returns (self_attention, score) exactly like the PyTorch module.

    x: (B, T, D) float32.
    score: (h*B, T, T) pre-mask / pre-softmax scaled scores (dtype=score_dtype;
           jnp.bfloat16 is the documented fast path -- it halves the dominant HBM
           write -- float32 matches the PyTorch module exactly).
    self_attention: (B, T, D) float32.
    compute_dtype: MXU operand dtype (default bfloat16; accumulation and softmax are
                   always f32). Use jnp.float32 for tight parity with f32 references.
    """
    B, T, D = x.shape
    wq, bq, wk, bk, wv, bv, wo, bo = params
    assert wo.shape == (h * dv, D)
    apply_mask = bool(mask) and (stage == "train")
    approx_recip = jnp.dtype(compute_dtype) != jnp.dtype(jnp.float32)

    kernel = partial(_mha_kernel, h=h, dq=dq, dv=dv, apply_mask=apply_mask,
                     compute_dtype=compute_dtype, approx_recip=approx_recip)

    def build_call(single_buffer_weights):
        const_kw = ({"pipeline_mode": pl.Buffered(1)}
                    if single_buffer_weights else {})

        def const(shape):
            zero = (0,) * len(shape)
            return pl.BlockSpec(shape, lambda b, hi, _z=zero: _z, **const_kw)

        in_specs = [
            pl.BlockSpec((1, T, D), lambda b, hi: (b, 0, 0)),   # x (one DMA per b)
            const((D, h * dq)), const((1, h * dq)),             # W_q, b_q
            const((D, h * dq)), const((1, h * dq)),             # W_k, b_k
            const((D, h * dv)), const((1, h * dv)),             # W_v, b_v
            pl.BlockSpec((dv, D), lambda b, hi: (hi, 0)),       # W_o slice for head hi
            const((1, D)),                                      # b_o
        ]
        out_specs = [
            pl.BlockSpec((1, 1, T, T), lambda b, hi: (hi, b, 0, 0)),  # score(head, b)
            pl.BlockSpec((1, T, D), lambda b, hi: (b, 0, 0)),         # lane-dense out
        ]
        return pl.pallas_call(
            kernel,
            out_shape=(
                jax.ShapeDtypeStruct((h, B, T, T), score_dtype),
                jax.ShapeDtypeStruct((B, T, D), jnp.float32),
            ),
            grid_spec=pltpu.PrefetchScalarGridSpec(
                num_scalar_prefetch=0,
                grid=(B, h),
                in_specs=in_specs,
                out_specs=out_specs,
                scratch_shapes=[
                    pltpu.VMEM((h, T, dq), compute_dtype),   # q_all (scaled)
                    pltpu.VMEM((h, T, dq), compute_dtype),   # k_all
                    pltpu.VMEM((h, T, dv), compute_dtype),   # v_all
                    pltpu.VMEM((T, D), jnp.float32),         # W_o accumulator
                ]),
            compiler_params=pltpu.CompilerParams(
                # Head axis carries scratch state (projections + accumulator), so it
                # must stay "arbitrary"; batch shards across v7x's 2 TensorCores.
                dimension_semantics=("parallel", "arbitrary"),
                vmem_limit_bytes=_vmem_limit_bytes(
                    T, D, h, dq, dv, compute_dtype, score_dtype),
            ),
        )

    args = (x, wq, bq.reshape(1, h * dq), wk, bk.reshape(1, h * dq),
            wv, bv.reshape(1, h * dv), wo, bo.reshape(1, D))
    try:
        score_hb, out = build_call(True)(*args)
    except Exception:
        # Fallback if pl.Buffered(1) single-buffering is rejected by this Pallas
        # version; it is a VMEM optimization only, results are identical.
        score_hb, out = build_call(False)(*args)

    # torch.cat(chunk(h, dim=-1), dim=0) layout: row hi*B + bi == (head hi, batch bi).
    # (h, B, T, T) -> (h*B, T, T) is a free row-major view.
    score = score_hb.reshape(h * B, T, T)

    # TODO(synk): nn.Dropout(p=0.1) is declared in __init__ but never applied in
    # forward(); omitted.
    return out, score


# ----------------------------- Reference (plain JAX) ------------------------

def _reference(x, params, *, h, dq, dv, stage="test", mask=False):
    B, T, D = x.shape
    wq, bq, wk, bk, wv, bv, wo, bo = params
    Q = jnp.concatenate(jnp.split(x @ wq + bq, h, axis=-1), axis=0)
    K = jnp.concatenate(jnp.split(x @ wk + bk, h, axis=-1), axis=0)
    V = jnp.concatenate(jnp.split(x @ wv + bv, h, axis=-1), axis=0)
    score = jnp.matmul(Q, jnp.swapaxes(K, -1, -2)) / math.sqrt(dq)
    s = score
    if mask and stage == "train":
        tri = jnp.tril(jnp.ones((T, T), jnp.float32))
        s = jnp.where(tri > 0, s, jnp.float32(-2 ** 32 + 1))
    p = jax.nn.softmax(s, axis=-1)
    attn = jnp.matmul(p, V)
    heads = jnp.concatenate(jnp.split(attn, h, axis=0), axis=-1)
    return heads @ wo + bo, score


# ----------------------------- Demo ------------------------------------------

if __name__ == "__main__":
    # Small shapes consistent with the module's forward.
    B, T = 2, 8
    d_model, q_dim, v_dim, heads = 32, 8, 8, 4

    key = jax.random.PRNGKey(0)
    ks = jax.random.split(key, 9)

    def init_linear(kw, kb, fan_in, fan_out):
        bound = 1.0 / math.sqrt(fan_in)
        w = jax.random.uniform(kw, (fan_in, fan_out), jnp.float32, -bound, bound)
        b = jax.random.uniform(kb, (fan_out,), jnp.float32, -bound, bound)
        return w, b

    wq, bq = init_linear(ks[0], ks[1], d_model, q_dim * heads)
    wk, bk = init_linear(ks[2], ks[3], d_model, q_dim * heads)
    wv, bv = init_linear(ks[4], ks[5], d_model, v_dim * heads)
    wo, bo = init_linear(ks[6], ks[7], v_dim * heads, d_model)
    params = (wq, bq, wk, bk, wv, bv, wo, bo)

    x = jax.random.normal(ks[8], (B, T, d_model), jnp.float32)

    # --- f32 parity path (test stage, no mask): tight tolerance vs f32 reference ---
    out, score = multi_head_attention(
        x, params, h=heads, dq=q_dim, dv=v_dim, stage="test", mask=False,
        compute_dtype=jnp.float32)
    out = jax.block_until_ready(out)
    score = jax.block_until_ready(score)

    ref_out, ref_score = _reference(
        x, params, h=heads, dq=q_dim, dv=v_dim, stage="test", mask=False)

    assert out.shape == (B, T, d_model)
    assert score.shape == (heads * B, T, T)
    assert jnp.allclose(out, ref_out, atol=1e-4, rtol=1e-4)
    assert jnp.allclose(score, ref_score, atol=1e-4, rtol=1e-4)

    # --- bf16 fast path (default), train stage with causal mask: bf16 tolerance ---
    out_m, score_m = multi_head_attention(
        x, params, h=heads, dq=q_dim, dv=v_dim, stage="train", mask=True)
    out_m = jax.block_until_ready(out_m)
    score_m = jax.block_until_ready(score_m)

    ref_out_m, ref_score_m = _reference(
        x, params, h=heads, dq=q_dim, dv=v_dim, stage="train", mask=True)

    assert jnp.allclose(out_m, ref_out_m, atol=5e-2, rtol=5e-2)
    assert jnp.allclose(score_m, ref_score_m, atol=5e-2, rtol=5e-2)

    print("KERNEL_OK")
</pallas_src>

<mosaic_0001>
module attributes {stable_mosaic.version = 11 : i64} {
  func.func @_mha_kernel(%arg0: i32, %arg1: i32, %arg2: memref<1x8x32xf32, #tpu.memory_space<vmem>>, %arg3: memref<32x32xf32, #tpu.memory_space<vmem>>, %arg4: memref<1x32xf32, #tpu.memory_space<vmem>>, %arg5: memref<32x32xf32, #tpu.memory_space<vmem>>, %arg6: memref<1x32xf32, #tpu.memory_space<vmem>>, %arg7: memref<32x32xf32, #tpu.memory_space<vmem>>, %arg8: memref<1x32xf32, #tpu.memory_space<vmem>>, %arg9: memref<8x32xf32, #tpu.memory_space<vmem>>, %arg10: memref<1x32xf32, #tpu.memory_space<vmem>>, %arg11: memref<1x1x8x8xf32, #tpu.memory_space<vmem>>, %arg12: memref<1x8x32xf32, #tpu.memory_space<vmem>>, %arg13: memref<4x8x8xf32, #tpu.memory_space<vmem>>, %arg14: memref<4x8x8xf32, #tpu.memory_space<vmem>>, %arg15: memref<4x8x8xf32, #tpu.memory_space<vmem>>, %arg16: memref<8x32xf32, #tpu.memory_space<vmem>>) attributes {dimension_semantics = [#tpu.dimension_semantics<parallel>, #tpu.dimension_semantics<arbitrary>], iteration_bounds = array<i64: 2, 4>, scalar_prefetch = 0 : i64, scratch_operands = 4 : i64, tpu.core_type = #tpu.core_type<tc>, window_params = [{transform_indices = @transform_0, window_bounds = array<i64: 1, 8, 32>}, {pipeline_mode = #tpu.pipeline_mode<synchronous>, transform_indices = @transform_1, window_bounds = array<i64: 32, 32>}, {pipeline_mode = #tpu.pipeline_mode<synchronous>, transform_indices = @transform_2, window_bounds = array<i64: 1, 32>}, {pipeline_mode = #tpu.pipeline_mode<synchronous>, transform_indices = @transform_3, window_bounds = array<i64: 32, 32>}, {pipeline_mode = #tpu.pipeline_mode<synchronous>, transform_indices = @transform_4, window_bounds = array<i64: 1, 32>}, {pipeline_mode = #tpu.pipeline_mode<synchronous>, transform_indices = @transform_5, window_bounds = array<i64: 32, 32>}, {pipeline_mode = #tpu.pipeline_mode<synchronous>, transform_indices = @transform_6, window_bounds = array<i64: 1, 32>}, {transform_indices = @transform_7, window_bounds = array<i64: 8, 32>}, {pipeline_mode = #tpu.pipeline_mode<synchronous>, transform_indices = @transform_8, window_bounds = array<i64: 1, 32>}, {transform_indices = @transform_9, window_bounds = array<i64: 1, 1, 8, 8>}, {transform_indices = @transform_10, window_bounds = array<i64: 1, 8, 32>}]} {
    %c0_i32 = arith.constant 0 : i32
    %0 = arith.cmpi eq, %arg1, %c0_i32 : i32
    %1 = arith.extui %0 : i1 to i32
    %c0_i32_0 = arith.constant 0 : i32
    %2 = arith.cmpi ne, %1, %c0_i32_0 : i32
    scf.if %2 {
      %c0_21 = arith.constant 0 : index
      %c0_22 = arith.constant 0 : index
      %c0_23 = arith.constant 0 : index
      %35 = vector.load %arg2[%c0_21, %c0_22, %c0_23] : memref<1x8x32xf32, #tpu.memory_space<vmem>>, vector<1x8x32xf32>
      %36 = vector.shape_cast %35 : vector<1x8x32xf32> to vector<8x32xf32>
      %c0_24 = arith.constant 0 : index
      %c0_25 = arith.constant 0 : index
      %37 = vector.load %arg3[%c0_24, %c0_25] : memref<32x32xf32, #tpu.memory_space<vmem>>, vector<32x32xf32>
      %cst_26 = arith.constant dense<0.000000e+00> : vector<8x32xf32>
      %38 = tpu.matmul %36, %37, %cst_26 {dimension_numbers = #tpu.dot_dimension_numbers<[1], [0], [0], [1], [0, 0, 1, 1], [], []>} : vector<8x32xf32>, vector<32x32xf32>, vector<8x32xf32> -> vector<8x32xf32>
      %c0_27 = arith.constant 0 : index
      %c0_28 = arith.constant 0 : index
      %39 = vector.load %arg4[%c0_27, %c0_28] : memref<1x32xf32, #tpu.memory_space<vmem>>, vector<1x32xf32>
      %40 = vector.broadcast %39 : vector<1x32xf32> to vector<8x32xf32>
      %41 = arith.addf %38, %40 : vector<8x32xf32>
      %cst_29 = arith.constant 0.353553385 : f32
      %42 = vector.broadcast %cst_29 : f32 to vector<8x32xf32>
      %43 = arith.mulf %41, %42 : vector<8x32xf32>
      %c0_30 = arith.constant 0 : index
      %c0_31 = arith.constant 0 : index
      %44 = vector.load %arg5[%c0_30, %c0_31] : memref<32x32xf32, #tpu.memory_space<vmem>>, vector<32x32xf32>
      %cst_32 = arith.constant dense<0.000000e+00> : vector<8x32xf32>
      %45 = tpu.matmul %36, %44, %cst_32 {dimension_numbers = #tpu.dot_dimension_numbers<[1], [0], [0], [1], [0, 0, 1, 1], [], []>} : vector<8x32xf32>, vector<32x32xf32>, vector<8x32xf32> -> vector<8x32xf32>
      %c0_33 = arith.constant 0 : index
      %c0_34 = arith.constant 0 : index
      %46 = vector.load %arg6[%c0_33, %c0_34] : memref<1x32xf32, #tpu.memory_space<vmem>>, vector<1x32xf32>
      %47 = vector.broadcast %46 : vector<1x32xf32> to vector<8x32xf32>
      %48 = arith.addf %45, %47 : vector<8x32xf32>
      %c0_35 = arith.constant 0 : index
      %c0_36 = arith.constant 0 : index
      %49 = vector.load %arg7[%c0_35, %c0_36] : memref<32x32xf32, #tpu.memory_space<vmem>>, vector<32x32xf32>
      %cst_37 = arith.constant dense<0.000000e+00> : vector<8x32xf32>
      %50 = tpu.matmul %36, %49, %cst_37 {dimension_numbers = #tpu.dot_dimension_numbers<[1], [0], [0], [1], [0, 0, 1, 1], [], []>} : vector<8x32xf32>, vector<32x32xf32>, vector<8x32xf32> -> vector<8x32xf32>
      %c0_38 = arith.constant 0 : index
      %c0_39 = arith.constant 0 : index
      %51 = vector.load %arg8[%c0_38, %c0_39] : memref<1x32xf32, #tpu.memory_space<vmem>>, vector<1x32xf32>
      %52 = vector.broadcast %51 : vector<1x32xf32> to vector<8x32xf32>
      %53 = arith.addf %50, %52 : vector<8x32xf32>
      %54 = vector.extract_strided_slice %43 {offsets = [0, 0], sizes = [8, 8], strides = [1, 1]} : vector<8x32xf32> to vector<8x8xf32>
      %c0_40 = arith.constant 0 : index
      %c0_41 = arith.constant 0 : index
      %c0_42 = arith.constant 0 : index
      %55 = vector.load %arg13[%c0_40, %c0_41, %c0_42] : memref<4x8x8xf32, #tpu.memory_space<vmem>>, vector<1x8x8xf32>
      %56 = vector.shape_cast %55 : vector<1x8x8xf32> to vector<8x8xf32>
      %57 = vector.shape_cast %54 : vector<8x8xf32> to vector<1x8x8xf32>
      tpu.vector_store %arg13[%c0_40, %c0_41, %c0_42], %57 {strides = array<i32>} : memref<4x8x8xf32, #tpu.memory_space<vmem>>, vector<1x8x8xf32>,
      %58 = vector.extract_strided_slice %48 {offsets = [0, 0], sizes = [8, 8], strides = [1, 1]} : vector<8x32xf32> to vector<8x8xf32>
      %c0_43 = arith.constant 0 : index
      %c0_44 = arith.constant 0 : index
      %c0_45 = arith.constant 0 : index
      %59 = vector.load %arg14[%c0_43, %c0_44, %c0_45] : memref<4x8x8xf32, #tpu.memory_space<vmem>>, vector<1x8x8xf32>
      %60 = vector.shape_cast %59 : vector<1x8x8xf32> to vector<8x8xf32>
      %61 = vector.shape_cast %58 : vector<8x8xf32> to vector<1x8x8xf32>
      tpu.vector_store %arg14[%c0_43, %c0_44, %c0_45], %61 {strides = array<i32>} : memref<4x8x8xf32, #tpu.memory_space<vmem>>, vector<1x8x8xf32>,
      %62 = vector.extract_strided_slice %53 {offsets = [0, 0], sizes = [8, 8], strides = [1, 1]} : vector<8x32xf32> to vector<8x8xf32>
      %c0_46 = arith.constant 0 : index
      %c0_47 = arith.constant 0 : index
      %c0_48 = arith.constant 0 : index
      %63 = vector.load %arg15[%c0_46, %c0_47, %c0_48] : memref<4x8x8xf32, #tpu.memory_space<vmem>>, vector<1x8x8xf32>
      %64 = vector.shape_cast %63 : vector<1x8x8xf32> to vector<8x8xf32>
      %65 = vector.shape_cast %62 : vector<8x8xf32> to vector<1x8x8xf32>
      tpu.vector_store %arg15[%c0_46, %c0_47, %c0_48], %65 {strides = array<i32>} : memref<4x8x8xf32, #tpu.memory_space<vmem>>, vector<1x8x8xf32>,
      %66 = vector.extract_strided_slice %43 {offsets = [0, 8], sizes = [8, 8], strides = [1, 1]} : vector<8x32xf32> to vector<8x8xf32>
      %c1 = arith.constant 1 : index
      %c0_49 = arith.constant 0 : index
      %c0_50 = arith.constant 0 : index
      %67 = vector.load %arg13[%c1, %c0_49, %c0_50] : memref<4x8x8xf32, #tpu.memory_space<vmem>>, vector<1x8x8xf32>
      %68 = vector.shape_cast %67 : vector<1x8x8xf32> to vector<8x8xf32>
      %69 = vector.shape_cast %66 : vector<8x8xf32> to vector<1x8x8xf32>
      tpu.vector_store %arg13[%c1, %c0_49, %c0_50], %69 {strides = array<i32>} : memref<4x8x8xf32, #tpu.memory_space<vmem>>, vector<1x8x8xf32>,
      %70 = vector.extract_strided_slice %48 {offsets = [0, 8], sizes = [8, 8], strides = [1, 1]} : vector<8x32xf32> to vector<8x8xf32>
      %c1_51 = arith.constant 1 : index
      %c0_52 = arith.constant 0 : index
      %c0_53 = arith.constant 0 : index
      %71 = vector.load %arg14[%c1_51, %c0_52, %c0_53] : memref<4x8x8xf32, #tpu.memory_space<vmem>>, vector<1x8x8xf32>
      %72 = vector.shape_cast %71 : vector<1x8x8xf32> to vector<8x8xf32>
      %73 = vector.shape_cast %70 : vector<8x8xf32> to vector<1x8x8xf32>
      tpu.vector_store %arg14[%c1_51, %c0_52, %c0_53], %73 {strides = array<i32>} : memref<4x8x8xf32, #tpu.memory_space<vmem>>, vector<1x8x8xf32>,
      %74 = vector.extract_strided_slice %53 {offsets = [0, 8], sizes = [8, 8], strides = [1, 1]} : vector<8x32xf32> to vector<8x8xf32>
      %c1_54 = arith.constant 1 : index
      %c0_55 = arith.constant 0 : index
      %c0_56 = arith.constant 0 : index
      %75 = vector.load %arg15[%c1_54, %c0_55, %c0_56] : memref<4x8x8xf32, #tpu.memory_space<vmem>>, vector<1x8x8xf32>
      %76 = vector.shape_cast %75 : vector<1x8x8xf32> to vector<8x8xf32>
      %77 = vector.shape_cast %74 : vector<8x8xf32> to vector<1x8x8xf32>
      tpu.vector_store %arg15[%c1_54, %c0_55, %c0_56], %77 {strides = array<i32>} : memref<4x8x8xf32, #tpu.memory_space<vmem>>, vector<1x8x8xf32>,
      %78 = vector.extract_strided_slice %43 {offsets = [0, 16], sizes = [8, 8], strides = [1, 1]} : vector<8x32xf32> to vector<8x8xf32>
      %c2 = arith.constant 2 : index
      %c0_57 = arith.constant 0 : index
      %c0_58 = arith.constant 0 : index
      %79 = vector.load %arg13[%c2, %c0_57, %c0_58] : memref<4x8x8xf32, #tpu.memory_space<vmem>>, vector<1x8x8xf32>
      %80 = vector.shape_cast %79 : vector<1x8x8xf32> to vector<8x8xf32>
      %81 = vector.shape_cast %78 : vector<8x8xf32> to vector<1x8x8xf32>
      tpu.vector_store %arg13[%c2, %c0_57, %c0_58], %81 {strides = array<i32>} : memref<4x8x8xf32, #tpu.memory_space<vmem>>, vector<1x8x8xf32>,
      %82 = vector.extract_strided_slice %48 {offsets = [0, 16], sizes = [8, 8], strides = [1, 1]} : vector<8x32xf32> to vector<8x8xf32>
      %c2_59 = arith.constant 2 : index
      %c0_60 = arith.constant 0 : index
      %c0_61 = arith.constant 0 : index
      %83 = vector.load %arg14[%c2_59, %c0_60, %c0_61] : memref<4x8x8xf32, #tpu.memory_space<vmem>>, vector<1x8x8xf32>
      %84 = vector.shape_cast %83 : vector<1x8x8xf32> to vector<8x8xf32>
      %85 = vector.shape_cast %82 : vector<8x8xf32> to vector<1x8x8xf32>
      tpu.vector_store %arg14[%c2_59, %c0_60, %c0_61], %85 {strides = array<i32>} : memref<4x8x8xf32, #tpu.memory_space<vmem>>, vector<1x8x8xf32>,
      %86 = vector.extract_strided_slice %53 {offsets = [0, 16], sizes = [8, 8], strides = [1, 1]} : vector<8x32xf32> to vector<8x8xf32>
      %c2_62 = arith.constant 2 : index
      %c0_63 = arith.constant 0 : index
      %c0_64 = arith.constant 0 : index
      %87 = vector.load %arg15[%c2_62, %c0_63, %c0_64] : memref<4x8x8xf32, #tpu.memory_space<vmem>>, vector<1x8x8xf32>
      %88 = vector.shape_cast %87 : vector<1x8x8xf32> to vector<8x8xf32>
      %89 = vector.shape_cast %86 : vector<8x8xf32> to vector<1x8x8xf32>
      tpu.vector_store %arg15[%c2_62, %c0_63, %c0_64], %89 {strides = array<i32>} : memref<4x8x8xf32, #tpu.memory_space<vmem>>, vector<1x8x8xf32>,
      %90 = vector.extract_strided_slice %43 {offsets = [0, 24], sizes = [8, 8], strides = [1, 1]} : vector<8x32xf32> to vector<8x8xf32>
      %c3 = arith.constant 3 : index
      %c0_65 = arith.constant 0 : index
      %c0_66 = arith.constant 0 : index
      %91 = vector.load %arg13[%c3, %c0_65, %c0_66] : memref<4x8x8xf32, #tpu.memory_space<vmem>>, vector<1x8x8xf32>
      %92 = vector.shape_cast %91 : vector<1x8x8xf32> to vector<8x8xf32>
      %93 = vector.shape_cast %90 : vector<8x8xf32> to vector<1x8x8xf32>
      tpu.vector_store %arg13[%c3, %c0_65, %c0_66], %93 {strides = array<i32>} : memref<4x8x8xf32, #tpu.memory_space<vmem>>, vector<1x8x8xf32>,
      %94 = vector.extract_strided_slice %48 {offsets = [0, 24], sizes = [8, 8], strides = [1, 1]} : vector<8x32xf32> to vector<8x8xf32>
      %c3_67 = arith.constant 3 : index
      %c0_68 = arith.constant 0 : index
      %c0_69 = arith.constant 0 : index
      %95 = vector.load %arg14[%c3_67, %c0_68, %c0_69] : memref<4x8x8xf32, #tpu.memory_space<vmem>>, vector<1x8x8xf32>
      %96 = vector.shape_cast %95 : vector<1x8x8xf32> to vector<8x8xf32>
      %97 = vector.shape_cast %94 : vector<8x8xf32> to vector<1x8x8xf32>
      tpu.vector_store %arg14[%c3_67, %c0_68, %c0_69], %97 {strides = array<i32>} : memref<4x8x8xf32, #tpu.memory_space<vmem>>, vector<1x8x8xf32>,
      %98 = vector.extract_strided_slice %53 {offsets = [0, 24], sizes = [8, 8], strides = [1, 1]} : vector<8x32xf32> to vector<8x8xf32>
      %c3_70 = arith.constant 3 : index
      %c0_71 = arith.constant 0 : index
      %c0_72 = arith.constant 0 : index
      %99 = vector.load %arg15[%c3_70, %c0_71, %c0_72] : memref<4x8x8xf32, #tpu.memory_space<vmem>>, vector<1x8x8xf32>
      %100 = vector.shape_cast %99 : vector<1x8x8xf32> to vector<8x8xf32>
      %101 = vector.shape_cast %98 : vector<8x8xf32> to vector<1x8x8xf32>
      tpu.vector_store %arg15[%c3_70, %c0_71, %c0_72], %101 {strides = array<i32>} : memref<4x8x8xf32, #tpu.memory_space<vmem>>, vector<1x8x8xf32>,
      %cst_73 = arith.constant 0.000000e+00 : f32
      %102 = vector.broadcast %cst_73 : f32 to vector<8x32xf32>
      %c0_74 = arith.constant 0 : index
      %c0_75 = arith.constant 0 : index
      %103 = vector.load %arg16[%c0_74, %c0_75] : memref<8x32xf32, #tpu.memory_space<vmem>>, vector<8x32xf32>
      tpu.vector_store %arg16[%c0_74, %c0_75], %102 {strides = array<i32>} : memref<8x32xf32, #tpu.memory_space<vmem>>, vector<8x32xf32>,
    } else {
    }
    %3 = arith.index_cast %arg1 : i32 to index
    %c0 = arith.constant 0 : index
    %c0_1 = arith.constant 0 : index
    %4 = vector.load %arg13[%3, %c0, %c0_1] : memref<4x8x8xf32, #tpu.memory_space<vmem>>, vector<1x8x8xf32>
    %5 = vector.shape_cast %4 : vector<1x8x8xf32> to vector<8x8xf32>
    %6 = arith.index_cast %arg1 : i32 to index
    %c0_2 = arith.constant 0 : index
    %c0_3 = arith.constant 0 : index
    %7 = vector.load %arg14[%6, %c0_2, %c0_3] : memref<4x8x8xf32, #tpu.memory_space<vmem>>, vector<1x8x8xf32>
    %8 = vector.shape_cast %7 : vector<1x8x8xf32> to vector<8x8xf32>
    %9 = arith.index_cast %arg1 : i32 to index
    %c0_4 = arith.constant 0 : index
    %c0_5 = arith.constant 0 : index
    %10 = vector.load %arg15[%9, %c0_4, %c0_5] : memref<4x8x8xf32, #tpu.memory_space<vmem>>, vector<1x8x8xf32>
    %11 = vector.shape_cast %10 : vector<1x8x8xf32> to vector<8x8xf32>
    %cst = arith.constant dense<0.000000e+00> : vector<8x8xf32>
    %12 = tpu.matmul %5, %8, %cst {dimension_numbers = #tpu.dot_dimension_numbers<[1], [1], [0], [0], [0, 0, 1, 0], [], []>} : vector<8x8xf32>, vector<8x8xf32>, vector<8x8xf32> -> vector<8x8xf32>
    %c0_6 = arith.constant 0 : index
    %c0_7 = arith.constant 0 : index
    %c0_8 = arith.constant 0 : index
    %c0_9 = arith.constant 0 : index
    %13 = vector.load %arg11[%c0_6, %c0_7, %c0_8, %c0_9] : memref<1x1x8x8xf32, #tpu.memory_space<vmem>>, vector<1x1x8x8xf32>
    %14 = vector.shape_cast %13 : vector<1x1x8x8xf32> to vector<8x8xf32>
    %15 = vector.shape_cast %12 : vector<8x8xf32> to vector<1x1x8x8xf32>
    tpu.vector_store %arg11[%c0_6, %c0_7, %c0_8, %c0_9], %15 {strides = array<i32>} : memref<1x1x8x8xf32, #tpu.memory_space<vmem>>, vector<1x1x8x8xf32>,
    %cst_10 = arith.constant dense<0xFF800000> : vector<8xf32>
    %16 = vector.multi_reduction <maximumf>, %12, %cst_10 [1] : vector<8x8xf32> to vector<8xf32>
    %17 = vector.shape_cast %16 : vector<8xf32> to vector<8x1xf32>
    %18 = vector.broadcast %17 : vector<8x1xf32> to vector<8x8xf32>
    %19 = arith.subf %12, %18 : vector<8x8xf32>
    %20 = math.exp %19 : vector<8x8xf32>
    %cst_11 = arith.constant dense<0.000000e+00> : vector<8xf32>
    %21 = vector.multi_reduction <add>, %20, %cst_11 [1] : vector<8x8xf32> to vector<8xf32>
    %22 = vector.shape_cast %21 : vector<8xf32> to vector<8x1xf32>
    %23 = tpu.reciprocal %22 : vector<8x1xf32> -> vector<8x1xf32>
    %24 = vector.broadcast %23 : vector<8x1xf32> to vector<8x8xf32>
    %25 = arith.mulf %20, %24 : vector<8x8xf32>
    %cst_12 = arith.constant dense<0.000000e+00> : vector<8x8xf32>
    %26 = tpu.matmul %25, %11, %cst_12 {dimension_numbers = #tpu.dot_dimension_numbers<[1], [0], [0], [1], [0, 0, 1, 1], [], []>} : vector<8x8xf32>, vector<8x8xf32>, vector<8x8xf32> -> vector<8x8xf32>
    %c0_13 = arith.constant 0 : index
    %c0_14 = arith.constant 0 : index
    %27 = vector.load %arg16[%c0_13, %c0_14] : memref<8x32xf32, #tpu.memory_space<vmem>>, vector<8x32xf32>
    %c0_15 = arith.constant 0 : index
    %c0_16 = arith.constant 0 : index
    %28 = vector.load %arg9[%c0_15, %c0_16] : memref<8x32xf32, #tpu.memory_space<vmem>>, vector<8x32xf32>
    %cst_17 = arith.constant dense<0.000000e+00> : vector<8x32xf32>
    %29 = tpu.matmul %26, %28, %cst_17 {dimension_numbers = #tpu.dot_dimension_numbers<[1], [0], [0], [1], [0, 0, 1, 1], [], []>} : vector<8x8xf32>, vector<8x32xf32>, vector<8x32xf32> -> vector<8x32xf32>
    %30 = arith.addf %27, %29 : vector<8x32xf32>
    %c0_18 = arith.constant 0 : index
    %c0_19 = arith.constant 0 : index
    %31 = vector.load %arg16[%c0_18, %c0_19] : memref<8x32xf32, #tpu.memory_space<vmem>>, vector<8x32xf32>
    tpu.vector_store %arg16[%c0_18, %c0_19], %30 {strides = array<i32>} : memref<8x32xf32, #tpu.memory_space<vmem>>, vector<8x32xf32>,
    %c3_i32 = arith.constant 3 : i32
    %32 = arith.cmpi eq, %arg1, %c3_i32 : i32
    %33 = arith.extui %32 : i1 to i32
    %c0_i32_20 = arith.constant 0 : i32
    %34 = arith.cmpi ne, %33, %c0_i32_20 : i32
    scf.if %34 {
      %c0_21 = arith.constant 0 : index
      %c0_22 = arith.constant 0 : index
      %35 = vector.load %arg16[%c0_21, %c0_22] : memref<8x32xf32, #tpu.memory_space<vmem>>, vector<8x32xf32>
      %c0_23 = arith.constant 0 : index
      %c0_24 = arith.constant 0 : index
      %36 = vector.load %arg10[%c0_23, %c0_24] : memref<1x32xf32, #tpu.memory_space<vmem>>, vector<1x32xf32>
      %37 = vector.broadcast %36 : vector<1x32xf32> to vector<8x32xf32>
      %38 = arith.addf %35, %37 : vector<8x32xf32>
      %c0_25 = arith.constant 0 : index
      %c0_26 = arith.constant 0 : index
      %c0_27 = arith.constant 0 : index
      %39 = vector.load %arg12[%c0_25, %c0_26, %c0_27] : memref<1x8x32xf32, #tpu.memory_space<vmem>>, vector<1x8x32xf32>
      %40 = vector.shape_cast %39 : vector<1x8x32xf32> to vector<8x32xf32>
      %41 = vector.shape_cast %38 : vector<8x32xf32> to vector<1x8x32xf32>
      tpu.vector_store %arg12[%c0_25, %c0_26, %c0_27], %41 {strides = array<i32>} : memref<1x8x32xf32, #tpu.memory_space<vmem>>, vector<1x8x32xf32>,
    } else {
    }
    return
  }
  func.func @transform_0(%arg0: i32, %arg1: i32) -> (i32, i32, i32) {
    %c0_i32 = arith.constant 0 : i32
    %c0_i32_0 = arith.constant 0 : i32
    %c0_i32_1 = arith.constant 0 : i32
    return %arg0, %c0_i32, %c0_i32_0 : i32, i32, i32
  }
  func.func @transform_1(%arg0: i32, %arg1: i32) -> (i32, i32) {
    %c0_i32 = arith.constant 0 : i32
    %c0_i32_0 = arith.constant 0 : i32
    %c0_i32_1 = arith.constant 0 : i32
    return %c0_i32, %c0_i32_0 : i32, i32
  }
  func.func @transform_2(%arg0: i32, %arg1: i32) -> (i32, i32) {
    %c0_i32 = arith.constant 0 : i32
    %c0_i32_0 = arith.constant 0 : i32
    %c0_i32_1 = arith.constant 0 : i32
    return %c0_i32, %c0_i32_0 : i32, i32
  }
  func.func @transform_3(%arg0: i32, %arg1: i32) -> (i32, i32) {
    %c0_i32 = arith.constant 0 : i32
    %c0_i32_0 = arith.constant 0 : i32
    %c0_i32_1 = arith.constant 0 : i32
    return %c0_i32, %c0_i32_0 : i32, i32
  }
  func.func @transform_4(%arg0: i32, %arg1: i32) -> (i32, i32) {
    %c0_i32 = arith.constant 0 : i32
    %c0_i32_0 = arith.constant 0 : i32
    %c0_i32_1 = arith.constant 0 : i32
    return %c0_i32, %c0_i32_0 : i32, i32
  }
  func.func @transform_5(%arg0: i32, %arg1: i32) -> (i32, i32) {
    %c0_i32 = arith.constant 0 : i32
    %c0_i32_0 = arith.constant 0 : i32
    %c0_i32_1 = arith.constant 0 : i32
    return %c0_i32, %c0_i32_0 : i32, i32
  }
  func.func @transform_6(%arg0: i32, %arg1: i32) -> (i32, i32) {
    %c0_i32 = arith.constant 0 : i32
    %c0_i32_0 = arith.constant 0 : i32
    %c0_i32_1 = arith.constant 0 : i32
    return %c0_i32, %c0_i32_0 : i32, i32
  }
  func.func @transform_7(%arg0: i32, %arg1: i32) -> (i32, i32) {
    %c0_i32 = arith.constant 0 : i32
    %c0_i32_0 = arith.constant 0 : i32
    return %arg1, %c0_i32 : i32, i32
  }
  func.func @transform_8(%arg0: i32, %arg1: i32) -> (i32, i32) {
    %c0_i32 = arith.constant 0 : i32
    %c0_i32_0 = arith.constant 0 : i32
    %c0_i32_1 = arith.constant 0 : i32
    return %c0_i32, %c0_i32_0 : i32, i32
  }
  func.func @transform_9(%arg0: i32, %arg1: i32) -> (i32, i32, i32, i32) {
    %c0_i32 = arith.constant 0 : i32
    %c0_i32_0 = arith.constant 0 : i32
    %c0_i32_1 = arith.constant 0 : i32
    return %arg1, %arg0, %c0_i32, %c0_i32_0 : i32, i32, i32, i32
  }
  func.func @transform_10(%arg0: i32, %arg1: i32) -> (i32, i32, i32) {
    %c0_i32 = arith.constant 0 : i32
    %c0_i32_0 = arith.constant 0 : i32
    %c0_i32_1 = arith.constant 0 : i32
    return %arg0, %c0_i32, %c0_i32_0 : i32, i32, i32
  }
}

module attributes {stable_mosaic.version = 11 : i64} {
  func.func @_mha_kernel(%arg0: i32, %arg1: i32, %arg2: memref<1x8x32xf32, #tpu.memory_space<vmem>>, %arg3: memref<32x32xf32, #tpu.memory_space<vmem>>, %arg4: memref<1x32xf32, #tpu.memory_space<vmem>>, %arg5: memref<32x32xf32, #tpu.memory_space<vmem>>, %arg6: memref<1x32xf32, #tpu.memory_space<vmem>>, %arg7: memref<32x32xf32, #tpu.memory_space<vmem>>, %arg8: memref<1x32xf32, #tpu.memory_space<vmem>>, %arg9: memref<8x32xf32, #tpu.memory_space<vmem>>, %arg10: memref<1x32xf32, #tpu.memory_space<vmem>>, %arg11: memref<1x1x8x8xf32, #tpu.memory_space<vmem>>, %arg12: memref<1x8x32xf32, #tpu.memory_space<vmem>>, %arg13: memref<4x8x8xf32, #tpu.memory_space<vmem>>, %arg14: memref<4x8x8xf32, #tpu.memory_space<vmem>>, %arg15: memref<4x8x8xf32, #tpu.memory_space<vmem>>, %arg16: memref<8x32xf32, #tpu.memory_space<vmem>>) attributes {dimension_semantics = [#tpu.dimension_semantics<parallel>, #tpu.dimension_semantics<arbitrary>], iteration_bounds = array<i64: 2, 4>, scalar_prefetch = 0 : i64, scratch_operands = 4 : i64, tpu.core_type = #tpu.core_type<tc>, window_params = [{transform_indices = @transform_0, window_bounds = array<i64: 1, 8, 32>}, {pipeline_mode = #tpu.pipeline_mode<synchronous>, transform_indices = @transform_1, window_bounds = array<i64: 32, 32>}, {pipeline_mode = #tpu.pipeline_mode<synchronous>, transform_indices = @transform_2, window_bounds = array<i64: 1, 32>}, {pipeline_mode = #tpu.pipeline_mode<synchronous>, transform_indices = @transform_3, window_bounds = array<i64: 32, 32>}, {pipeline_mode = #tpu.pipeline_mode<synchronous>, transform_indices = @transform_4, window_bounds = array<i64: 1, 32>}, {pipeline_mode = #tpu.pipeline_mode<synchronous>, transform_indices = @transform_5, window_bounds = array<i64: 32, 32>}, {pipeline_mode = #tpu.pipeline_mode<synchronous>, transform_indices = @transform_6, window_bounds = array<i64: 1, 32>}, {transform_indices = @transform_7, window_bounds = array<i64: 8, 32>}, {pipeline_mode = #tpu.pipeline_mode<synchronous>, transform_indices = @transform_8, window_bounds = array<i64: 1, 32>}, {transform_indices = @transform_9, window_bounds = array<i64: 1, 1, 8, 8>}, {transform_indices = @transform_10, window_bounds = array<i64: 1, 8, 32>}]} {
    %c0_i32 = arith.constant 0 : i32
    %0 = arith.cmpi eq, %arg1, %c0_i32 : i32
    %1 = arith.extui %0 : i1 to i32
    %c0_i32_0 = arith.constant 0 : i32
    %2 = arith.cmpi ne, %1, %c0_i32_0 : i32
    scf.if %2 {
      %c0_21 = arith.constant 0 : index
      %c0_22 = arith.constant 0 : index
      %c0_23 = arith.constant 0 : index
      %35 = vector.load %arg2[%c0_21, %c0_22, %c0_23] : memref<1x8x32xf32, #tpu.memory_space<vmem>>, vector<1x8x32xf32>
      %36 = vector.shape_cast %35 : vector<1x8x32xf32> to vector<8x32xf32>
      %c0_24 = arith.constant 0 : index
      %c0_25 = arith.constant 0 : index
      %37 = vector.load %arg3[%c0_24, %c0_25] : memref<32x32xf32, #tpu.memory_space<vmem>>, vector<32x32xf32>
      %cst_26 = arith.constant dense<0.000000e+00> : vector<8x32xf32>
      %38 = tpu.matmul %36, %37, %cst_26 {dimension_numbers = #tpu.dot_dimension_numbers<[1], [0], [0], [1], [0, 0, 1, 1], [], []>} : vector<8x32xf32>, vector<32x32xf32>, vector<8x32xf32> -> vector<8x32xf32>
      %c0_27 = arith.constant 0 : index
      %c0_28 = arith.constant 0 : index
      %39 = vector.load %arg4[%c0_27, %c0_28] : memref<1x32xf32, #tpu.memory_space<vmem>>, vector<1x32xf32>
      %40 = vector.broadcast %39 : vector<1x32xf32> to vector<8x32xf32>
      %41 = arith.addf %38, %40 : vector<8x32xf32>
      %cst_29 = arith.constant 0.353553385 : f32
      %42 = vector.broadcast %cst_29 : f32 to vector<8x32xf32>
      %43 = arith.mulf %41, %42 : vector<8x32xf32>
      %c0_30 = arith.constant 0 : index
      %c0_31 = arith.constant 0 : index
      %44 = vector.load %arg5[%c0_30, %c0_31] : memref<32x32xf32, #tpu.memory_space<vmem>>, vector<32x32xf32>
      %cst_32 = arith.constant dense<0.000000e+00> : vector<8x32xf32>
      %45 = tpu.matmul %36, %44, %cst_32 {dimension_numbers = #tpu.dot_dimension_numbers<[1], [0], [0], [1], [0, 0, 1, 1], [], []>} : vector<8x32xf32>, vector<32x32xf32>, vector<8x32xf32> -> vector<8x32xf32>
      %c0_33 = arith.constant 0 : index
      %c0_34 = arith.constant 0 : index
      %46 = vector.load %arg6[%c0_33, %c0_34] : memref<1x32xf32, #tpu.memory_space<vmem>>, vector<1x32xf32>
      %47 = vector.broadcast %46 : vector<1x32xf32> to vector<8x32xf32>
      %48 = arith.addf %45, %47 : vector<8x32xf32>
      %c0_35 = arith.constant 0 : index
      %c0_36 = arith.constant 0 : index
      %49 = vector.load %arg7[%c0_35, %c0_36] : memref<32x32xf32, #tpu.memory_space<vmem>>, vector<32x32xf32>
      %cst_37 = arith.constant dense<0.000000e+00> : vector<8x32xf32>
      %50 = tpu.matmul %36, %49, %cst_37 {dimension_numbers = #tpu.dot_dimension_numbers<[1], [0], [0], [1], [0, 0, 1, 1], [], []>} : vector<8x32xf32>, vector<32x32xf32>, vector<8x32xf32> -> vector<8x32xf32>
      %c0_38 = arith.constant 0 : index
      %c0_39 = arith.constant 0 : index
      %51 = vector.load %arg8[%c0_38, %c0_39] : memref<1x32xf32, #tpu.memory_space<vmem>>, vector<1x32xf32>
      %52 = vector.broadcast %51 : vector<1x32xf32> to vector<8x32xf32>
      %53 = arith.addf %50, %52 : vector<8x32xf32>
      %54 = vector.extract_strided_slice %43 {offsets = [0, 0], sizes = [8, 8], strides = [1, 1]} : vector<8x32xf32> to vector<8x8xf32>
      %c0_40 = arith.constant 0 : index
      %c0_41 = arith.constant 0 : index
      %c0_42 = arith.constant 0 : index
      %55 = vector.load %arg13[%c0_40, %c0_41, %c0_42] : memref<4x8x8xf32, #tpu.memory_space<vmem>>, vector<1x8x8xf32>
      %56 = vector.shape_cast %55 : vector<1x8x8xf32> to vector<8x8xf32>
      %57 = vector.shape_cast %54 : vector<8x8xf32> to vector<1x8x8xf32>
      tpu.vector_store %arg13[%c0_40, %c0_41, %c0_42], %57 {strides = array<i32>} : memref<4x8x8xf32, #tpu.memory_space<vmem>>, vector<1x8x8xf32>,
      %58 = vector.extract_strided_slice %48 {offsets = [0, 0], sizes = [8, 8], strides = [1, 1]} : vector<8x32xf32> to vector<8x8xf32>
      %c0_43 = arith.constant 0 : index
      %c0_44 = arith.constant 0 : index
      %c0_45 = arith.constant 0 : index
      %59 = vector.load %arg14[%c0_43, %c0_44, %c0_45] : memref<4x8x8xf32, #tpu.memory_space<vmem>>, vector<1x8x8xf32>
      %60 = vector.shape_cast %59 : vector<1x8x8xf32> to vector<8x8xf32>
      %61 = vector.shape_cast %58 : vector<8x8xf32> to vector<1x8x8xf32>
      tpu.vector_store %arg14[%c0_43, %c0_44, %c0_45], %61 {strides = array<i32>} : memref<4x8x8xf32, #tpu.memory_space<vmem>>, vector<1x8x8xf32>,
      %62 = vector.extract_strided_slice %53 {offsets = [0, 0], sizes = [8, 8], strides = [1, 1]} : vector<8x32xf32> to vector<8x8xf32>
      %c0_46 = arith.constant 0 : index
      %c0_47 = arith.constant 0 : index
      %c0_48 = arith.constant 0 : index
      %63 = vector.load %arg15[%c0_46, %c0_47, %c0_48] : memref<4x8x8xf32, #tpu.memory_space<vmem>>, vector<1x8x8xf32>
      %64 = vector.shape_cast %63 : vector<1x8x8xf32> to vector<8x8xf32>
      %65 = vector.shape_cast %62 : vector<8x8xf32> to vector<1x8x8xf32>
      tpu.vector_store %arg15[%c0_46, %c0_47, %c0_48], %65 {strides = array<i32>} : memref<4x8x8xf32, #tpu.memory_space<vmem>>, vector<1x8x8xf32>,
      %66 = vector.extract_strided_slice %43 {offsets = [0, 8], sizes = [8, 8], strides = [1, 1]} : vector<8x32xf32> to vector<8x8xf32>
      %c1 = arith.constant 1 : index
      %c0_49 = arith.constant 0 : index
      %c0_50 = arith.constant 0 : index
      %67 = vector.load %arg13[%c1, %c0_49, %c0_50] : memref<4x8x8xf32, #tpu.memory_space<vmem>>, vector<1x8x8xf32>
      %68 = vector.shape_cast %67 : vector<1x8x8xf32> to vector<8x8xf32>
      %69 = vector.shape_cast %66 : vector<8x8xf32> to vector<1x8x8xf32>
      tpu.vector_store %arg13[%c1, %c0_49, %c0_50], %69 {strides = array<i32>} : memref<4x8x8xf32, #tpu.memory_space<vmem>>, vector<1x8x8xf32>,
      %70 = vector.extract_strided_slice %48 {offsets = [0, 8], sizes = [8, 8], strides = [1, 1]} : vector<8x32xf32> to vector<8x8xf32>
      %c1_51 = arith.constant 1 : index
      %c0_52 = arith.constant 0 : index
      %c0_53 = arith.constant 0 : index
      %71 = vector.load %arg14[%c1_51, %c0_52, %c0_53] : memref<4x8x8xf32, #tpu.memory_space<vmem>>, vector<1x8x8xf32>
      %72 = vector.shape_cast %71 : vector<1x8x8xf32> to vector<8x8xf32>
      %73 = vector.shape_cast %70 : vector<8x8xf32> to vector<1x8x8xf32>
      tpu.vector_store %arg14[%c1_51, %c0_52, %c0_53], %73 {strides = array<i32>} : memref<4x8x8xf32, #tpu.memory_space<vmem>>, vector<1x8x8xf32>,
      %74 = vector.extract_strided_slice %53 {offsets = [0, 8], sizes = [8, 8], strides = [1, 1]} : vector<8x32xf32> to vector<8x8xf32>
      %c1_54 = arith.constant 1 : index
      %c0_55 = arith.constant 0 : index
      %c0_56 = arith.constant 0 : index
      %75 = vector.load %arg15[%c1_54, %c0_55, %c0_56] : memref<4x8x8xf32, #tpu.memory_space<vmem>>, vector<1x8x8xf32>
      %76 = vector.shape_cast %75 : vector<1x8x8xf32> to vector<8x8xf32>
      %77 = vector.shape_cast %74 : vector<8x8xf32> to vector<1x8x8xf32>
      tpu.vector_store %arg15[%c1_54, %c0_55, %c0_56], %77 {strides = array<i32>} : memref<4x8x8xf32, #tpu.memory_space<vmem>>, vector<1x8x8xf32>,
      %78 = vector.extract_strided_slice %43 {offsets = [0, 16], sizes = [8, 8], strides = [1, 1]} : vector<8x32xf32> to vector<8x8xf32>
      %c2 = arith.constant 2 : index
      %c0_57 = arith.constant 0 : index
      %c0_58 = arith.constant 0 : index
      %79 = vector.load %arg13[%c2, %c0_57, %c0_58] : memref<4x8x8xf32, #tpu.memory_space<vmem>>, vector<1x8x8xf32>
      %80 = vector.shape_cast %79 : vector<1x8x8xf32> to vector<8x8xf32>
      %81 = vector.shape_cast %78 : vector<8x8xf32> to vector<1x8x8xf32>
      tpu.vector_store %arg13[%c2, %c0_57, %c0_58], %81 {strides = array<i32>} : memref<4x8x8xf32, #tpu.memory_space<vmem>>, vector<1x8x8xf32>,
      %82 = vector.extract_strided_slice %48 {offsets = [0, 16], sizes = [8, 8], strides = [1, 1]} : vector<8x32xf32> to vector<8x8xf32>
      %c2_59 = arith.constant 2 : index
      %c0_60 = arith.constant 0 : index
      %c0_61 = arith.constant 0 : index
      %83 = vector.load %arg14[%c2_59, %c0_60, %c0_61] : memref<4x8x8xf32, #tpu.memory_space<vmem>>, vector<1x8x8xf32>
      %84 = vector.shape_cast %83 : vector<1x8x8xf32> to vector<8x8xf32>
      %85 = vector.shape_cast %82 : vector<8x8xf32> to vector<1x8x8xf32>
      tpu.vector_store %arg14[%c2_59, %c0_60, %c0_61], %85 {strides = array<i32>} : memref<4x8x8xf32, #tpu.memory_space<vmem>>, vector<1x8x8xf32>,
      %86 = vector.extract_strided_slice %53 {offsets = [0, 16], sizes = [8, 8], strides = [1, 1]} : vector<8x32xf32> to vector<8x8xf32>
      %c2_62 = arith.constant 2 : index
      %c0_63 = arith.constant 0 : index
      %c0_64 = arith.constant 0 : index
      %87 = vector.load %arg15[%c2_62, %c0_63, %c0_64] : memref<4x8x8xf32, #tpu.memory_space<vmem>>, vector<1x8x8xf32>
      %88 = vector.shape_cast %87 : vector<1x8x8xf32> to vector<8x8xf32>
      %89 = vector.shape_cast %86 : vector<8x8xf32> to vector<1x8x8xf32>
      tpu.vector_store %arg15[%c2_62, %c0_63, %c0_64], %89 {strides = array<i32>} : memref<4x8x8xf32, #tpu.memory_space<vmem>>, vector<1x8x8xf32>,
      %90 = vector.extract_strided_slice %43 {offsets = [0, 24], sizes = [8, 8], strides = [1, 1]} : vector<8x32xf32> to vector<8x8xf32>
      %c3 = arith.constant 3 : index
      %c0_65 = arith.constant 0 : index
      %c0_66 = arith.constant 0 : index
      %91 = vector.load %arg13[%c3, %c0_65, %c0_66] : memref<4x8x8xf32, #tpu.memory_space<vmem>>, vector<1x8x8xf32>
      %92 = vector.shape_cast %91 : vector<1x8x8xf32> to vector<8x8xf32>
      %93 = vector.shape_cast %90 : vector<8x8xf32> to vector<1x8x8xf32>
      tpu.vector_store %arg13[%c3, %c0_65, %c0_66], %93 {strides = array<i32>} : memref<4x8x8xf32, #tpu.memory_space<vmem>>, vector<1x8x8xf32>,
      %94 = vector.extract_strided_slice %48 {offsets = [0, 24], sizes = [8, 8], strides = [1, 1]} : vector<8x32xf32> to vector<8x8xf32>
      %c3_67 = arith.constant 3 : index
      %c0_68 = arith.constant 0 : index
      %c0_69 = arith.constant 0 : index
      %95 = vector.load %arg14[%c3_67, %c0_68, %c0_69] : memref<4x8x8xf32, #tpu.memory_space<vmem>>, vector<1x8x8xf32>
      %96 = vector.shape_cast %95 : vector<1x8x8xf32> to vector<8x8xf32>
      %97 = vector.shape_cast %94 : vector<8x8xf32> to vector<1x8x8xf32>
      tpu.vector_store %arg14[%c3_67, %c0_68, %c0_69], %97 {strides = array<i32>} : memref<4x8x8xf32, #tpu.memory_space<vmem>>, vector<1x8x8xf32>,
      %98 = vector.extract_strided_slice %53 {offsets = [0, 24], sizes = [8, 8], strides = [1, 1]} : vector<8x32xf32> to vector<8x8xf32>
      %c3_70 = arith.constant 3 : index
      %c0_71 = arith.constant 0 : index
      %c0_72 = arith.constant 0 : index
      %99 = vector.load %arg15[%c3_70, %c0_71, %c0_72] : memref<4x8x8xf32, #tpu.memory_space<vmem>>, vector<1x8x8xf32>
      %100 = vector.shape_cast %99 : vector<1x8x8xf32> to vector<8x8xf32>
      %101 = vector.shape_cast %98 : vector<8x8xf32> to vector<1x8x8xf32>
      tpu.vector_store %arg15[%c3_70, %c0_71, %c0_72], %101 {strides = array<i32>} : memref<4x8x8xf32, #tpu.memory_space<vmem>>, vector<1x8x8xf32>,
      %cst_73 = arith.constant 0.000000e+00 : f32
      %102 = vector.broadcast %cst_73 : f32 to vector<8x32xf32>
      %c0_74 = arith.constant 0 : index
      %c0_75 = arith.constant 0 : index
      %103 = vector.load %arg16[%c0_74, %c0_75] : memref<8x32xf32, #tpu.memory_space<vmem>>, vector<8x32xf32>
      tpu.vector_store %arg16[%c0_74, %c0_75], %102 {strides = array<i32>} : memref<8x32xf32, #tpu.memory_space<vmem>>, vector<8x32xf32>,
    } else {
    }
    %3 = arith.index_cast %arg1 : i32 to index
    %c0 = arith.constant 0 : index
    %c0_1 = arith.constant 0 : index
    %4 = vector.load %arg13[%3, %c0, %c0_1] : memref<4x8x8xf32, #tpu.memory_space<vmem>>, vector<1x8x8xf32>
    %5 = vector.shape_cast %4 : vector<1x8x8xf32> to vector<8x8xf32>
    %6 = arith.index_cast %arg1 : i32 to index
    %c0_2 = arith.constant 0 : index
    %c0_3 = arith.constant 0 : index
    %7 = vector.load %arg14[%6, %c0_2, %c0_3] : memref<4x8x8xf32, #tpu.memory_space<vmem>>, vector<1x8x8xf32>
    %8 = vector.shape_cast %7 : vector<1x8x8xf32> to vector<8x8xf32>
    %9 = arith.index_cast %arg1 : i32 to index
    %c0_4 = arith.constant 0 : index
    %c0_5 = arith.constant 0 : index
    %10 = vector.load %arg15[%9, %c0_4, %c0_5] : memref<4x8x8xf32, #tpu.memory_space<vmem>>, vector<1x8x8xf32>
    %11 = vector.shape_cast %10 : vector<1x8x8xf32> to vector<8x8xf32>
    %cst = arith.constant dense<0.000000e+00> : vector<8x8xf32>
    %12 = tpu.matmul %5, %8, %cst {dimension_numbers = #tpu.dot_dimension_numbers<[1], [1], [0], [0], [0, 0, 1, 0], [], []>} : vector<8x8xf32>, vector<8x8xf32>, vector<8x8xf32> -> vector<8x8xf32>
    %c0_6 = arith.constant 0 : index
    %c0_7 = arith.constant 0 : index
    %c0_8 = arith.constant 0 : index
    %c0_9 = arith.constant 0 : index
    %13 = vector.load %arg11[%c0_6, %c0_7, %c0_8, %c0_9] : memref<1x1x8x8xf32, #tpu.memory_space<vmem>>, vector<1x1x8x8xf32>
    %14 = vector.shape_cast %13 : vector<1x1x8x8xf32> to vector<8x8xf32>
    %15 = vector.shape_cast %12 : vector<8x8xf32> to vector<1x1x8x8xf32>
    tpu.vector_store %arg11[%c0_6, %c0_7, %c0_8, %c0_9], %15 {strides = array<i32>} : memref<1x1x8x8xf32, #tpu.memory_space<vmem>>, vector<1x1x8x8xf32>,
    %cst_10 = arith.constant dense<0xFF800000> : vector<8xf32>
    %16 = vector.multi_reduction <maximumf>, %12, %cst_10 [1] : vector<8x8xf32> to vector<8xf32>
    %17 = vector.shape_cast %16 : vector<8xf32> to vector<8x1xf32>
    %18 = vector.broadcast %17 : vector<8x1xf32> to vector<8x8xf32>
    %19 = arith.subf %12, %18 : vector<8x8xf32>
    %20 = math.exp %19 : vector<8x8xf32>
    %cst_11 = arith.constant dense<0.000000e+00> : vector<8xf32>
    %21 = vector.multi_reduction <add>, %20, %cst_11 [1] : vector<8x8xf32> to vector<8xf32>
    %22 = vector.shape_cast %21 : vector<8xf32> to vector<8x1xf32>
    %23 = tpu.reciprocal %22 : vector<8x1xf32> -> vector<8x1xf32>
    %24 = vector.broadcast %23 : vector<8x1xf32> to vector<8x8xf32>
    %25 = arith.mulf %20, %24 : vector<8x8xf32>
    %cst_12 = arith.constant dense<0.000000e+00> : vector<8x8xf32>
    %26 = tpu.matmul %25, %11, %cst_12 {dimension_numbers = #tpu.dot_dimension_numbers<[1], [0], [0], [1], [0, 0, 1, 1], [], []>} : vector<8x8xf32>, vector<8x8xf32>, vector<8x8xf32> -> vector<8x8xf32>
    %c0_13 = arith.constant 0 : index
    %c0_14 = arith.constant 0 : index
    %27 = vector.load %arg16[%c0_13, %c0_14] : memref<8x32xf32, #tpu.memory_space<vmem>>, vector<8x32xf32>
    %c0_15 = arith.constant 0 : index
    %c0_16 = arith.constant 0 : index
    %28 = vector.load %arg9[%c0_15, %c0_16] : memref<8x32xf32, #tpu.memory_space<vmem>>, vector<8x32xf32>
    %cst_17 = arith.constant dense<0.000000e+00> : vector<8x32xf32>
    %29 = tpu.matmul %26, %28, %cst_17 {dimension_numbers = #tpu.dot_dimension_numbers<[1], [0], [0], [1], [0, 0, 1, 1], [], []>} : vector<8x8xf32>, vector<8x32xf32>, vector<8x32xf32> -> vector<8x32xf32>
    %30 = arith.addf %27, %29 : vector<8x32xf32>
    %c0_18 = arith.constant 0 : index
    %c0_19 = arith.constant 0 : index
    %31 = vector.load %arg16[%c0_18, %c0_19] : memref<8x32xf32, #tpu.memory_space<vmem>>, vector<8x32xf32>
    tpu.vector_store %arg16[%c0_18, %c0_19], %30 {strides = array<i32>} : memref<8x32xf32, #tpu.memory_space<vmem>>, vector<8x32xf32>,
    %c3_i32 = arith.constant 3 : i32
    %32 = arith.cmpi eq, %arg1, %c3_i32 : i32
    %33 = arith.extui %32 : i1 to i32
    %c0_i32_20 = arith.constant 0 : i32
    %34 = arith.cmpi ne, %33, %c0_i32_20 : i32
    scf.if %34 {
      %c0_21 = arith.constant 0 : index
      %c0_22 = arith.constant 0 : index
      %35 = vector.load %arg16[%c0_21, %c0_22] : memref<8x32xf32, #tpu.memory_space<vmem>>, vector<8x32xf32>
      %c0_23 = arith.constant 0 : index
      %c0_24 = arith.constant 0 : index
      %36 = vector.load %arg10[%c0_23, %c0_24] : memref<1x32xf32, #tpu.memory_space<vmem>>, vector<1x32xf32>
      %37 = vector.broadcast %36 : vector<1x32xf32> to vector<8x32xf32>
      %38 = arith.addf %35, %37 : vector<8x32xf32>
      %c0_25 = arith.constant 0 : index
      %c0_26 = arith.constant 0 : index
      %c0_27 = arith.constant 0 : index
      %39 = vector.load %arg12[%c0_25, %c0_26, %c0_27] : memref<1x8x32xf32, #tpu.memory_space<vmem>>, vector<1x8x32xf32>
      %40 = vector.shape_cast %39 : vector<1x8x32xf32> to vector<8x32xf32>
      %41 = vector.shape_cast %38 : vector<8x32xf32> to vector<1x8x32xf32>
      tpu.vector_store %arg12[%c0_25, %c0_26, %c0_27], %41 {strides = array<i32>} : memref<1x8x32xf32, #tpu.memory_space<vmem>>, vector<1x8x32xf32>,
    } else {
    }
    return
  }
  func.func @transform_0(%arg0: i32, %arg1: i32) -> (i32, i32, i32) {
    %c0_i32 = arith.constant 0 : i32
    %c0_i32_0 = arith.constant 0 : i32
    %c0_i32_1 = arith.constant 0 : i32
    return %arg0, %c0_i32, %c0_i32_0 : i32, i32, i32
  }
  func.func @transform_1(%arg0: i32, %arg1: i32) -> (i32, i32) {
    %c0_i32 = arith.constant 0 : i32
    %c0_i32_0 = arith.constant 0 : i32
    %c0_i32_1 = arith.constant 0 : i32
    return %c0_i32, %c0_i32_0 : i32, i32
  }
  func.func @transform_2(%arg0: i32, %arg1: i32) -> (i32, i32) {
    %c0_i32 = arith.constant 0 : i32
    %c0_i32_0 = arith.constant 0 : i32
    %c0_i32_1 = arith.constant 0 : i32
    return %c0_i32, %c0_i32_0 : i32, i32
  }
  func.func @transform_3(%arg0: i32, %arg1: i32) -> (i32, i32) {
    %c0_i32 = arith.constant 0 : i32
    %c0_i32_0 = arith.constant 0 : i32
    %c0_i32_1 = arith.constant 0 : i32
    return %c0_i32, %c0_i32_0 : i32, i32
  }
  func.func @transform_4(%arg0: i32, %arg1: i32) -> (i32, i32) {
    %c0_i32 = arith.constant 0 : i32
    %c0_i32_0 = arith.constant 0 : i32
    %c0_i32_1 = arith.constant 0 : i32
    return %c0_i32, %c0_i32_0 : i32, i32
  }
  func.func @transform_5(%arg0: i32, %arg1: i32) -> (i32, i32) {
    %c0_i32 = arith.constant 0 : i32
    %c0_i32_0 = arith.constant 0 : i32
    %c0_i32_1 = arith.constant 0 : i32
    return %c0_i32, %c0_i32_0 : i32, i32
  }
  func.func @transform_6(%arg0: i32, %arg1: i32) -> (i32, i32) {
    %c0_i32 = arith.constant 0 : i32
    %c0_i32_0 = arith.constant 0 : i32
    %c0_i32_1 = arith.constant 0 : i32
    return %c0_i32, %c0_i32_0 : i32, i32
  }
  func.func @transform_7(%arg0: i32, %arg1: i32) -> (i32, i32) {
    %c0_i32 = arith.constant 0 : i32
    %c0_i32_0 = arith.constant 0 : i32
    return %arg1, %c0_i32 : i32, i32
  }
  func.func @transform_8(%arg0: i32, %arg1: i32) -> (i32, i32) {
    %c0_i32 = arith.constant 0 : i32
    %c0_i32_0 = arith.constant 0 : i32
    %c0_i32_1 = arith.constant 0 : i32
    return %c0_i32, %c0_i32_0 : i32, i32
  }
  func.func @transform_9(%arg0: i32, %arg1: i32) -> (i32, i32, i32, i32) {
    %c0_i32 = arith.constant 0 : i32
    %c0_i32_0 = arith.constant 0 : i32
    %c0_i32_1 = arith.constant 0 : i32
    return %arg1, %arg0, %c0_i32, %c0_i32_0 : i32, i32, i32, i32
  }
  func.func @transform_10(%arg0: i32, %arg1: i32) -> (i32, i32, i32) {
    %c0_i32 = arith.constant 0 : i32
    %c0_i32_0 = arith.constant 0 : i32
    %c0_i32_1 = arith.constant 0 : i32
    return %arg0, %c0_i32, %c0_i32_0 : i32, i32, i32
  }
}

</mosaic_0001>

<bundles_post_ra>
// kernel: tpu_custom_call.1
= control target key start
LH: loop header
LB: loop body
LE: loop exit
PB: predicated region body
PF: predicated region fallthrough
CT: control target
= control target key end

     0   :  { %s2494_s0 = inlined_call_operand.hbm [shape: f32[2,8,32], index: 0, kind: input, shape index: {}]   ;;  %s2495_s1 = inlined_call_operand.hbm [shape: f32[32,32], index: 1, kind: input, shape index: {}]   ;;  %s2496_s2 = inlined_call_operand.vmem [shape: f32[1,32], index: 2, kind: input, shape index: {}]   ;;  %s2497_s3 = inlined_call_operand.hbm [shape: f32[32,32], index: 3, kind: input, shape index: {}]   ;;  %s2498_s4 = inlined_call_operand.vmem [shape: f32[1,32], index: 4, kind: input, shape index: {}]   ;;  %s2499_s5 = inlined_call_operand.hbm [shape: f32[32,32], index: 5, kind: input, shape index: {}]   ;;  %s2500_s6 = inlined_call_operand.vmem [shape: f32[1,32], index: 6, kind: input, shape index: {}]   ;;  %s2501_s7 = inlined_call_operand.hbm [shape: f32[32,32], index: 7, kind: input, shape index: {}]   ;;  %s2502_s8 = inlined_call_operand.vmem [shape: f32[1,32], index: 8, kind: input, shape index: {}]   ;;  %s2503_s9 = inlined_call_operand.hbm [shape: f32[4,2,8,8], index: 9, kind: output, shape index: {0}]   ;;  %s2504_s10 = inlined_call_operand.hbm [shape: f32[2,8,32], index: 10, kind: output, shape index: {1}]  }
   0x1   :  { %2536 = sst [smem:[#allocation35_spill]] %s2494_s0 }
   0x2   :  { %2537 = sst [smem:[#allocation36_spill]] %s2495_s1 }
   0x3   :  { %2538 = sst [smem:[#allocation37_spill]] %s2496_s2 }
   0x4   :  { %2539 = sst [smem:[#allocation38_spill]] %s2497_s3 }
   0x5   :  { %2540 = sst [smem:[#allocation39_spill]] %s2498_s4 }
   0x6   :  { %2541 = sst [smem:[#allocation40_spill]] %s2499_s5 }
   0x7   :  { %2542 = sst [smem:[#allocation41_spill]] %s2500_s6 }
   0x8   :  { %2543 = sst [smem:[#allocation42_spill]] %s2502_s8 }
   0x9   :  { %2544 = sst [smem:[#allocation43_spill]] %s2503_s9 }
   0xa   :  { %2545 = sst [smem:[#allocation44_spill]] %s2504_s10 }
   0xb   :  { %16 = vsyncpa [#allocation7], 0 }
   0xc   :  { %18 = vsyncpa [#allocation7 + $0x1], 0 }
   0xd   :  { %19 = vsyncpa [#allocation10], 0 }
   0xe   :  { %20 = vsyncpa [#allocation13], 0 }
   0xf   :  { %21 = vsyncpa [#allocation8], 0 }
  0x10   :  { %23 = vsyncpa [#allocation8 + $0x1], 0 }
  0x11   :  { %24 = vsyncpa [#allocation17], 0 }
  0x12   :  { %26 = vsyncpa [#allocation17 + $0x1], 0  ;;  %s1965_s13 = smov 0   ;;  %s1967_s14 = smov 0  }
  0x13   :  { %s1969_s15 = smov 0   ;;  %s1971_s16 = smov 0  }
  0x14   :  { %s1973_s17 = smov 0   ;;  %s1975_s18 = smov 0  }
  0x15   :  { %s1977_s19 = smov 0   ;;  %s1979_s20 = smov 0  }
  0x16   :  { %s1981_s21 = smov 0   ;;  %s1983_s22 = smov 0  }
  0x17   :  { %s1985_s23 = smov 0   ;;  %s1987_s24 = smov 0  }
  0x18   :  { %s1989_s25 = smov 0   ;;  %s1991_s26 = smov 0  }
  0x19 LB: > { %2546 = sst [smem:[#allocation24_spill]] %s1839_s13  ;;  %s2036_s27 = sadd.s32 4294967295, %s1891_s26   ;;  %s1891_s26 = sphi %s1991_s26, %s32_s26   ;;  %s1887_s25 = sphi %s1989_s25, %s2629_s25   ;;  %s1883_s24 = sphi %s1987_s24, %s2628_s24   ;;  %s1879_s23 = sphi %s1985_s23, %s2627_s23   ;;  %s1875_s22 = sphi %s1983_s22, %s2626_s22   ;;  %s1871_s21 = sphi %s1981_s21, %s2625_s21   ;;  %s1867_s20 = sphi %s1979_s20, %s2624_s20   ;;  %s1863_s19 = sphi %s1977_s19, %s2623_s19   ;;  %s1859_s18 = sphi %s1975_s18, %s2622_s18   ;;  %s1855_s17 = sphi %s1973_s17, %s2621_s17   ;;  %s1851_s16 = sphi %s1971_s16, %s2620_s16   ;;  %s1847_s15 = sphi %s1969_s15, %s2619_s15   ;;  %s1843_s14 = sphi %s1967_s14, %s2618_s14   ;;  %s1839_s13 = sphi %s1965_s13, %s2615_s13  }
  0x1a   : > { %2547 = sst [smem:[#allocation25_spill]] %s1843_s14  ;;  %p1251_p0 = scmp.ge.s32.totalorder %s1891_s26, 1 }
  0x1b   : > { %2548 = sst [smem:[#allocation26_spill]] %s1863_s19  ;;  %p2508_p1 = scmp.eq.s32.totalorder %s2036_s27, 0 }
  0x1c   : > { %2549 = sst [smem:[#allocation27_spill]] %s1875_s22  ;;  %p302_p2 = scmp.lt.s32.totalorder %s1891_s26, 9 }
  0x1d   : > { %2550 = sst [smem:[#allocation28_spill]] %s1879_s23  ;;  %s1893_s29 = smov [#allocation9]  }
  0x1e   : > { %p2041_p3 = pnand %p1251_p0, %p302_p2  ;;  %s314_s30 = sshll.u32 %s1893_s29, 4  ;;  %s315_s30 = int_to_ptr.vmem [resolvable:$true] %s314_s30 }
  0x1f   : > { %s2553_s1 = sld [smem:[#allocation36_spill]] }
  0x20   : > { %s2551_s28 = scalar_select %p2041_p3, 1, 0 }
  0x21   : > { %p1396_p4 = pneg %p2041_p3 }
  0x23   : > { %p2049_p5 = pnand %p1396_p4, %p2508_p1 }
  0x25   : > { %s2552_s11 = scalar_select %p2049_p5, 1, 0 }
  0x26   : > { %s1557_s9 = scalar_lea.hbm %s2553_s1, 512  ;;  %p2061_p7 = pneg %p2049_p5 }
  0x27   : > { %p1558_p6 = scmp.ne.s32.totalorder %s2553_s1, %s1557_s9  ;;  %p1564_p10 = scmp.lt.u32.totalorder %s1557_s9, %s2553_s1 }
  0x29   : > { %p1560_p8 = pnand %p2061_p7, %p1558_p6 }
  0x2b   : > { %p1561_p9 = pneg %p1560_p8 }
  0x2d   : > { %p1566_p11 = pnand %p1564_p10, %p1561_p9 }
  0x2f   : > { %1569 = shalt.err (!%p1566_p11)
}
  0x30   : > { %s1570_s10 = scalar_lea.vmem %s315_s30, 512  ;;  %p1578_p2 = scmp.lt.s32.totalorder %s315_s30, %s315_s30 }
  0x31   : > { %p1571_p12 = scmp.ne.s32.totalorder %s315_s30, %s1570_s10  ;;  %p1579_p4 = scmp.lt.s32.totalorder %s1570_s10, %s1570_s10 }
  0x33   : > { %p1573_p13 = pnand %p1571_p12, %p2061_p7  ;;  %p1580_p1 = por %p1579_p4, %p1578_p2 }
  0x35   : > { %p1574_p0 = pneg %p1573_p13 }
  0x37   : > { %p1581_p3 = pnand %p1580_p1, %p1574_p0 }
  0x39   : > { %1584 = shalt.err (!%p1581_p3)
}
  0x3a   : > { %s2513_s8 = smov 128   ;;  %s2515_s4 = smov 8  }
  0x3b   : > { %1399 = dma.hbm_to_vmem [thread:$0]  (!%p2049_p5), %s2553_s1, 512, %s315_s30, [#allocation10], %s2513_s8, %s2513_s8, %s2515_s4  }
  0x3c   : > { %s1250_s23 = sadd.s32 4294967294, %s1891_s26   ;;  %p58_p1 = scmp.ne.s32.totalorder %s1871_s21, %s1867_s20 }
  0x3d   : > { %p2510_p3 = scmp.eq.s32.totalorder %s1891_s26, 0  ;;  %p64_p6 = scmp.ne.s32.totalorder %s1867_s20, %s1863_s19 }
  0x3e   : > { %p262_p8 = scmp.ne.s32.totalorder %s1847_s15, %s1843_s14  ;;  %p263_p10 = scmp.eq.s32.totalorder %s2036_s27, 7 }
  0x3f   : > { %p2092_p9 = por %p2510_p3, %p58_p1  ;;  %p2556_p11 = scmp.eq.s32.totalorder %s2036_s27, 0 }
  0x40   : > { %p268_p13 = scmp.ne.s32.totalorder %s1843_s14, %s1839_s13  ;;  %p2105_p0 = por %p263_p10, %p262_p8 }
  0x41   : > { %p2099_p12 = por %p2556_p11, %p64_p6  ;;  %p269_p2 = scmp.eq.s32.totalorder %s1250_s23, 7 }
  0x42   : > { %s2558_s30 = scalar_select %p2105_p0, 1, 0 }
  0x43   : > { %s2557_s6 = scalar_select %p2099_p12, 1, 0 }
  0x44   : > { %2559 = sst [smem:[#allocation29_spill]] %s2558_s30  ;;  %p2109_p4 = por %p263_p10, %p58_p1 }
  0x45   : > { %p2528_p3 = scmp.lt.s32.totalorder %s1891_s26, 8  ;;  %p2114_p5 = por %p269_p2, %p268_p13 }
  0x46   : > { %s2560_s9 = scalar_select %p2109_p4, 1, 0 }
  0x47   : > { %s2562_s10 = scalar_select %p2114_p5, 1, 0 }
  0x48   : > { %2561 = sst [smem:[#allocation30_spill]] %s2560_s9  ;;  %p2118_p11 = por %p269_p2, %p64_p6 }
  0x49   : > { %2563 = sst [smem:[#allocation31_spill]] %s2562_s10  ;;  %s366_s8 = sand.u32 1, %s1891_s26  }
  0x4a   : > { %s2564_s12 = scalar_select %p2118_p11, 1, 0 }
  0x4b   : > { %s368_s4 = sand.u32 1, %s1871_s21   ;;  %s1257_s19 = sshll.u32 %s1887_s25, 7 }
  0x4c   : > { %2565 = sst [smem:[#allocation32_spill]] %s2564_s12  ;;  %s1256_s1 = sshll.u32 %s368_s4, 3 }
  0x4d   : > { %s2566_s0 = sld [smem:[#allocation35_spill]]  ;;  %s370_s9 = scalar_lea.vmem [#allocation6], %s1256_s1 }
  0x4e   : > { %s377_s22 = sshll.u32 %s370_s9, 4  ;;  %p2136_p1 = pnand %p2528_p3, %p2092_p9  ;;  %s2130_s22 = int_to_ptr.vmem [resolvable:$true] %s377_s22 }
  0x4f   : > { %s1896_s4 = smov [#allocation11]  }
  0x50   : > { %s2140_s13 = sshll.u32 %s1896_s4, 4  ;;  %p1587_p8 = pneg %p2136_p1  ;;  %s331_s13 = int_to_ptr.vmem [resolvable:$true] %s2140_s13 }
  0x53   : > { %s2128_s23 = scalar_lea.hbm %s2566_s0, %s1257_s19  ;;  %s2142_s19 = scalar_lea.sflag [#allocation7], %s366_s8 }
  0x54   : > { %s1585_s30 = scalar_lea.hbm %s2128_s23, 128  ;;  %s1590_s9 = scalar_lea.hbm %s2566_s0, 256 }
  0x55   : > { %p1586_p6 = scmp.ne.s32.totalorder %s2128_s23, %s1585_s30  ;;  %p1591_p9 = scmp.lt.u32.totalorder %s2128_s23, %s2566_s0 }
  0x56   : > { %p1592_p2 = scmp.lt.u32.totalorder %s1590_s9, %s1585_s30  ;;  %p1594_p11 = scmp.lt.u32.totalorder %s1585_s30, %s2128_s23 }
  0x57   : > { %p1588_p10 = pnand %p1587_p8, %p1586_p6 }
  0x58   : > { %p1593_p3 = por %p1592_p2, %p1591_p9 }
  0x59   : > { %p1589_p13 = pneg %p1588_p10 }
  0x5a   : > { %p1595_p5 = por %p1594_p11, %p1593_p3 }
  0x5c   : > { %p1596_p4 = pnand %p1595_p5, %p1589_p13 }
  0x5e   : > { %1599 = shalt.err (!%p1596_p4)
}
  0x5f   : > { %s1600_s8 = scalar_lea.vmem %s2130_s22, 128  ;;  %s1897_s4 = smov [#allocation6]  }
  0x60   : > { %p1601_p6 = scmp.ne.s32.totalorder %s2130_s22, %s1600_s8  ;;  %s1605_s1 = sshll.u32 %s1897_s4, 4  ;;  %s1606_s1 = int_to_ptr.vmem [resolvable:$false] %s1605_s1 }
  0x61   : > { %s1607_s14 = scalar_lea.vmem %s1606_s1, 256  ;;  %p1608_p12 = scmp.lt.s32.totalorder %s2130_s22, %s1606_s1 }
  0x62   : > { %p1603_p10 = pnand %p1601_p6, %p1587_p8  ;;  %p1609_p9 = scmp.lt.s32.totalorder %s1607_s14, %s1600_s8 }
  0x64   : > { %p1604_p0 = pneg %p1603_p10  ;;  %p1610_p2 = por %p1609_p9, %p1608_p12 }
  0x66   : > { %p1611_p3 = pnand %p1610_p2, %p1604_p0 }
  0x68   : > { %1614 = shalt.err (!%p1611_p3)
}
  0x69   : > { %1409 = dma.hbm_to_vmem [thread:$0]  (!%p2136_p1), %s2128_s23, 128, %s2130_s22, %s2142_s19  }
  0x6a   : > { %s1898_s10 = smov [#allocation12]   ;;  %s2568_s3 = sld [smem:[#allocation38_spill]] }
  0x6b   : > { %s346_s30 = sshll.u32 %s1898_s10, 4  ;;  %s347_s30 = int_to_ptr.vmem [resolvable:$true] %s346_s30 }
  0x70   : > { %s1615_s4 = scalar_lea.hbm %s2568_s3, 512 }
  0x71   : > { %p1616_p5 = scmp.ne.s32.totalorder %s2568_s3, %s1615_s4  ;;  %p1622_p4 = scmp.lt.u32.totalorder %s1615_s4, %s2568_s3 }
  0x73   : > { %p1618_p12 = pnand %p1616_p5, %p2061_p7 }
  0x75   : > { %p1619_p0 = pneg %p1618_p12 }
  0x77   : > { %p1624_p11 = pnand %p1622_p4, %p1619_p0 }
  0x79   : > { %1627 = shalt.err (!%p1624_p11)
}
  0x7a   : > { %s1628_s22 = scalar_lea.vmem %s331_s13, 512  ;;  %p1636_p6 = scmp.lt.s32.totalorder %s331_s13, %s331_s13 }
  0x7b   : > { %p1629_p1 = scmp.ne.s32.totalorder %s331_s13, %s1628_s22  ;;  %p1637_p10 = scmp.lt.s32.totalorder %s1628_s22, %s1628_s22 }
  0x7d   : > { %p1631_p8 = pnand %p1629_p1, %p2061_p7  ;;  %p1638_p9 = por %p1637_p10, %p1636_p6 }
  0x7f   : > { %p1632_p13 = pneg %p1631_p8 }
  0x81   : > { %p1639_p2 = pnand %p1638_p9, %p1632_p13 }
  0x83   : > { %1642 = shalt.err (!%p1639_p2)
}
  0x84   : > { %p2569_p3 = scmp.ne.s32.totalorder %s2552_s11, 0  ;;  %s2570_s23 = smov 8  }
  0x85   : > { %s2571_s10 = smov 128   ;;  %s2572_s5 = sld [smem:[#allocation40_spill]] }
  0x86   : > { %1402 = dma.hbm_to_vmem [thread:$0]  (!%p2569_p3), %s2568_s3, 512, %s331_s13, [#allocation10], %s2571_s10, %s2571_s10, %s2570_s23  }
  0x8b   : > { %s1643_s8 = scalar_lea.hbm %s2572_s5, 512 }
  0x8c   : > { %p1644_p5 = scmp.ne.s32.totalorder %s2572_s5, %s1643_s8  ;;  %p1650_p4 = scmp.lt.u32.totalorder %s1643_s8, %s2572_s5 }
  0x8e   : > { %p1646_p12 = pnand %p1644_p5, %p2061_p7 }
  0x90   : > { %p1647_p0 = pneg %p1646_p12 }
  0x92   : > { %p1652_p11 = pnand %p1650_p4, %p1647_p0 }
  0x94   : > { %1655 = shalt.err (!%p1652_p11)
}
  0x95   : > { %s1656_s2 = scalar_lea.vmem %s347_s30, 512  ;;  %p1664_p6 = scmp.lt.s32.totalorder %s347_s30, %s347_s30 }
  0x96   : > { %p1657_p1 = scmp.ne.s32.totalorder %s347_s30, %s1656_s2  ;;  %p1665_p10 = scmp.lt.s32.totalorder %s1656_s2, %s1656_s2 }
  0x98   : > { %p1659_p8 = pnand %p1657_p1, %p2061_p7  ;;  %p1666_p9 = por %p1665_p10, %p1664_p6 }
  0x9a   : > { %p1660_p13 = pneg %p1659_p8 }
  0x9c   : > { %p1667_p2 = pnand %p1666_p9, %p1660_p13 }
  0x9e   : > { %1670 = shalt.err (!%p1667_p2)
}
  0x9f   : > { %1405 = dma.hbm_to_vmem [thread:$0]  (!%p2569_p3), %s2572_s5, 512, %s347_s30, [#allocation13], %s2571_s10, %s2571_s10, %s2570_s23  }
  0xa0   : > { %s41_s11 = sadd.s32 1, %s1883_s24  ;;  %s203_s29 = sadd.s32 1, %s1859_s18 }
  0xa1   : > { %p42_p7 = scmp.ge.s32.totalorder %s41_s11, 4  ;;  %p210_p5 = scmp.ne.s32.totalorder %s1859_s18, %s1855_s17 }
  0xa2   : > { %p216_p12 = scmp.ne.s32.totalorder %s1855_s17, %s1851_s16  ;;  %s2574_s9 = sadd.s32 1, %s1887_s25 }
  0xa3   : > { %s2631_s11 = smov (%p42_p7, %s41_s11), 0  ;;  %s2633_s9 = smov (!%p42_p7, %s2574_s9), %s1887_s25 }
  0xa4   : > { %2573 = sst [smem:[#allocation33_spill]] %s2631_s11  ;;  %s200_s4 = ssub.s32 %s1883_s24, %s2631_s11 }
  0xa5   : > { %p2575_p0 = scmp.eq.s32.totalorder %s1891_s26, 0  ;;  %p46_p3 = scmp.ge.s32.totalorder %s2633_s9, 2 }
  0xa6   : > { %p201_p11 = scmp.eq.s32.totalorder %s200_s4, 0  ;;  %p2577_p1 = scmp.eq.s32.totalorder %s2036_s27, 0 }
  0xa7   : > { %p2228_p4 = por %p210_p5, %p2575_p0  ;;  %s252_s23 = sadd.s32 1, %s1847_s15 }
  0xa8   : > { %p2234_p8 = por %p216_p12, %p2577_p1  ;;  %s2635_s9 = smov (%p46_p3, %s2633_s9), 0 }
  0xa9   : > { %2579 = sst [smem:[#allocation34_spill]] %s2635_s9  ;;  %s48_s1 = ssub.s32 %s1887_s25, %s2635_s9 }
  0xaa   : > { %s2242_s10 = scalar_select %p201_p11, %s1859_s18, %s203_s29  }
  0xab   : > { %s386_s8 = sand.u32 1, %s1859_s18   ;;  %p49_p13 = scmp.eq.s32.totalorder %s48_s1, 0 }
  0xac   : > { %s249_s12 = sor.u32 %s200_s4, %s48_s1  ;;  %s1258_s14 = sshll.u32 %s386_s8, 3 }
  0xad   : > { %p250_p6 = scmp.eq.s32.totalorder %s249_s12, 0  ;;  %s2580_s22 = sadd.s32 1, %s1871_s21 }
  0xae   : > { %s2250_s2 = scalar_select %p49_p13, %s1871_s21, %s2580_s22  }
  0xaf   : > { %s2253_s0 = scalar_select %p250_p6, %s1847_s15, %s252_s23  }
  0xb0   : > { %s1259_s13 = sshll.u32 %s1883_s24, 7  ;;  %s388_s29 = scalar_lea.vmem [#allocation14], %s1258_s14 }
  0xb1   : > { %s2259_s11 = scalar_lea.hbm %s2501_s7, %s1259_s13  ;;  %s395_s9 = sshll.u32 %s388_s29, 4  ;;  %s2261_s9 = int_to_ptr.vmem [resolvable:$true] %s395_s9 }
  0xb2   : > { %p2581_p10 = scmp.lt.s32.totalorder %s1891_s26, 8  ;;  %s1671_s23 = scalar_lea.hbm %s2259_s11, 128 }
  0xb3   : > { %p1672_p2 = scmp.ne.s32.totalorder %s2259_s11, %s1671_s23  ;;  %s1676_s1 = scalar_lea.hbm %s2501_s7, 512 }
  0xb4   : > { %p2267_p9 = pnand %p2581_p10, %p2228_p4  ;;  %p1677_p0 = scmp.lt.u32.totalorder %s2259_s11, %s2501_s7 }
  0xb5   : > { %p1678_p4 = scmp.lt.u32.totalorder %s1676_s1, %s1671_s23  ;;  %p1680_p11 = scmp.lt.u32.totalorder %s1671_s23, %s2259_s11 }
  0xb6   : > { %p1673_p7 = pneg %p2267_p9 }
  0xb7   : > { %p1679_p3 = por %p1678_p4, %p1677_p0 }
  0xb8   : > { %p1674_p5 = pnand %p1673_p7, %p1672_p2 }
  0xb9   : > { %p1681_p1 = por %p1680_p11, %p1679_p3 }
  0xba   : > { %p1675_p12 = pneg %p1674_p5 }
  0xbc   : > { %p1682_p13 = pnand %p1681_p1, %p1675_p12 }
  0xbe   : > { %1685 = shalt.err (!%p1682_p13)
}
  0xbf   : > { %s1686_s12 = scalar_lea.vmem %s2261_s9, 128  ;;  %s1899_s14 = smov [#allocation14]  }
  0xc0   : > { %p1687_p6 = scmp.ne.s32.totalorder %s2261_s9, %s1686_s12  ;;  %s1691_s22 = sshll.u32 %s1899_s14, 4  ;;  %s1692_s22 = int_to_ptr.vmem [resolvable:$false] %s1691_s22 }
  0xc1   : > { %s1693_s13 = scalar_lea.vmem %s1692_s22, 256  ;;  %p1694_p5 = scmp.lt.s32.totalorder %s2261_s9, %s1692_s22 }
  0xc2   : > { %p1689_p10 = pnand %p1687_p6, %p1673_p7  ;;  %p1695_p0 = scmp.lt.s32.totalorder %s1693_s13, %s1686_s12 }
  0xc4   : > { %p1690_p2 = pneg %p1689_p10  ;;  %p1696_p4 = por %p1695_p0, %p1694_p5 }
  0xc6   : > { %p1697_p3 = pnand %p1696_p4, %p1690_p2 }
  0xc8   : > { %1700 = shalt.err (!%p1697_p3)
}
  0xc9   : > { %1412 = dma.hbm_to_vmem [thread:$0]  (!%p2267_p9), %s2259_s11, 128, %s2261_s9, %s2142_s19  }
  0xca   : > { %p2583_p12 = scmp.ne.s32.totalorder %s2551_s28, 0 }
  0xcb   : > { %s406_s29 = sand.u32 (!%p2583_p12), 1, %s2036_s27   ;;  %s2534_s23 = sand.u32 (!%p2583_p12), 1, %s1867_s20  }
  0xcc   : > { %404 = sbr.rel (%p2583_p12) target bundleno = 1620 (0x654), region = 56  ;;  %s2303_s3 = sshll.u32 (!%p2583_p12), %s2534_s23, 3 }
  0xcd   : > { %s407_s5 = scalar_lea.sflag (!%p2583_p12), [#allocation7], %s406_s29  ;;  %s410_s1 = scalar_lea.vmem (!%p2583_p12), [#allocation6], %s2303_s3 }
  0xce   : > { %p2584_p7 = scmp.ne.s32.totalorder (!%p2583_p12), %s2557_s6, 0 }
  0xd3   : > { %1814 = dma.done.wait (%p2584_p7), %s407_s5, 128  }
  0xd4   : > { %1816 = vsyncadd (%p2584_p7), %s407_s5, 4294967168  ;;  %p2585_p9 = scmp.eq.s32.totalorder %s2036_s27, 0 }
  0xd6   : > { %1818 = dma.done.wait (%p2585_p9), [#allocation10], 1024   ;;  %p2586_p11 = pmov %p2585_p9 }
  0xd7   : > { %p2587_p1 = pmov %p2585_p9 }
  0xd8   : > { %1820 = vsyncadd (%p2586_p11), [#allocation10], 4294966272 }
  0xd9   : > { %1822 = dma.done.wait (%p2587_p1), [#allocation13], 512   ;;  %p2588_p13 = pmov %p2587_p1 }
  0xda   : > { %s429_s28 = sand.u32 1, %s1855_s17  }
  0xdb   : > { %1824 = vsyncadd (%p2588_p13), [#allocation13], 4294966784  ;;  %s2319_s19 = sshll.u32 %s429_s28, 3 }
  0xdc   : > { %s431_s6 = scalar_lea.vmem [#allocation14], %s2319_s19 }
  0xdd   : > { %1826 = dma.done.wait (%p2234_p8), %s407_s5, 128  }
  0xde   : > { %1828 = vsyncadd (%p2234_p8), %s407_s5, 4294967168  ;;  %s2589_s11 = sld [smem:[#allocation25_spill]]  ;;  %s2535_s30 = scalar_lea.vmem [#allocation16], %s2303_s3 }
  0xdf   : > { %s2590_s8 = sld [smem:[#allocation27_spill]] }
  0xe4   : > { %s468_s9 = sand.u32 1, %s2589_s11  }
  0xe5   : > { %s2329_s4 = sshll.u32 %s468_s9, 3  ;;  %p1268_p6 = scmp.ne.s32.totalorder %s2590_s8, 0 }
  0xe6   : > { %s470_s27 = scalar_lea.vmem [#allocation15], %s2329_s4  ;;  %v483_v0 = vld [vmem:[#allocation9] sm:$0xff] (!%p1268_p6)  ;;  %v484_v1 = vld [vmem:[#allocation9 + $0x8] sm:$0xff] (!%p1268_p6)  ;;  %v1900_v3 = vmov (!%p1268_p6), 0.0|0.0   ;;  %v485_v6 = vld [vmem:[#allocation9 + $0x10] sm:$0xff] (!%p1268_p6)  ;;  %vm494_vm0 = vcmask (!%p1268_p6), 261120  }
  0xe7   : > { %481 = sbr.rel (%p1268_p6) target bundleno = 587 (0x24b), region = 80  ;;  %v569_v2 = vld [vmem:[#allocation11] sm:$0xff] (!%p1268_p6)  ;;  %1358 = vmatprep.subr.bf16.mxu0 (!%p1268_p6), %v1900_v3  ;;  %1364 = vmatprep.subr.bf16.mxu1 (!%p1268_p6), %v1900_v3  ;;  %v1359_v4 = vpack.c.bf16 (!%p1268_p6), %v484_v1, %v483_v0  ;;  %v570_v5 = vld [vmem:[#allocation11 + $0x8] sm:$0xff] (!%p1268_p6)  ;;  %v486_v7 = vld [vmem:[#allocation9 + $0x18] sm:$0xff] (!%p1268_p6)  ;;  %vm1901_vm1 = vmmov (!%p1268_p6), 0   ;;  %v1902_v11 = vmov (!%p1268_p6), 0.0  }
  0xe8   : > { %v1365_v8 = vpack.c.bf16 (!%p1268_p6), %v570_v5, %v569_v2  ;;  %v571_v9 = vld [vmem:[#allocation11 + $0x10] sm:$0xff] (!%p1268_p6)  ;;  %v572_v10 = vld [vmem:[#allocation11 + $0x18] sm:$0xff] (!%p1268_p6)  ;;  %1318 = vmatprep.mubr.msk.f32.mxu0 (!%p1268_p6), %vm1901_vm1, %v1902_v11  ;;  %1329 = vmatprep.mubr.msk.f32.mxu1 (!%p1268_p6), %vm1901_vm1, %v1902_v11  ;;  %783 = vst.msk [vmem:[#allocation5] sm:$0xff] (!%p1268_p6), %vm494_vm0, %v1902_v11  ;;  %v1362_v12 = vpack.c.bf16 (!%p1268_p6), %v486_v7, %v485_v6  ;;  %v650_v14 = vld [vmem:[#allocation12] sm:$0xff] (!%p1268_p6)  ;;  %s2591_s14 = sld [smem:[#allocation37_spill]] (!%p1268_p6)  ;;  %s2592_s29 = sld [smem:[#allocation39_spill]] (!%p1268_p6) }
  0xe9   : > { %1360 = vmatpush3.bf16.msra.mxu0 (!%p1268_p6), %v1359_v4  ;;  %v1368_v13 = vpack.c.bf16 (!%p1268_p6), %v572_v10, %v571_v9  ;;  %v651_v15 = vld [vmem:[#allocation12 + $0x8] sm:$0xff] (!%p1268_p6)  ;;  %v482_v16 = vld [vmem:[%s410_s1] sm:$0xff] (!%p1268_p6)  ;;  %vm731_vm2 = vcmask (!%p1268_p6), 64512   ;;  %s1903_s5 = smov (!%p1268_p6), 120   ;;  %s1904_s1 = smov (!%p1268_p6), 112  }
  0xea   : > { %1366 = vmatpush3.bf16.msra.mxu1 (!%p1268_p6), %v1365_v8  ;;  %1361 = vmatprep.subr.bf16.mxu0 (!%p1268_p6), %v1900_v3  ;;  %v1371_v17 = vpack.c.bf16 (!%p1268_p6), %v651_v15, %v650_v14  ;;  %v652_v18 = vld [vmem:[#allocation12 + $0x10] sm:$0xff] (!%p1268_p6)  ;;  %v653_v19 = vld [vmem:[#allocation12 + $0x18] sm:$0xff] (!%p1268_p6)  ;;  %s2593_s8 = sld [smem:[#allocation41_spill]] (!%p1268_p6)  ;;  %s1905_s16 = smov (!%p1268_p6), 104  }
  0xeb   : > { %1367 = vmatprep.subr.bf16.mxu1 (!%p1268_p6), %v1900_v3  ;;  %v1374_v20 = vpack.c.bf16 (!%p1268_p6), %v653_v19, %v652_v18 }
  0xed   : > { %1363 = vmatpush3.bf16.msra.mxu0 (!%p1268_p6), %v1362_v12 }
  0xee   : > { %1369 = vmatpush3.bf16.msra.mxu1 %v1368_v13  ;;  %1370 = vmatprep.subr.bf16.mxu0 %v1900_v3  ;;  %v1269_v21 = vld [vmem:[%s2591_s14] ss:$0 sm:$0xff] }
  0xef   : > { %v1271_v22 = vld [vmem:[%s2592_s29] ss:$0 sm:$0xff] }
  0xf0   : > { %1319 = vmatmul.mubr.msk.f32.vlgmr.msra.gmra.mrb[0].mxu0 %vm494_vm0, %v482_v16  ;;  %v1273_v30 = vld [vmem:[%s2593_s8] ss:$0 sm:$0xff] }
  0xf1   : > { %1330 = vmatmul.mubr.msk.f32.vlgmr.msra.gmra.mrb[0].mxu1 %vm494_vm0, %v482_v16  ;;  %1372 = vmatpush3.bf16.msra.mxu0 %v1371_v17 }
  0xf2   : > { %1373 = vmatprep.subr.bf16.mxu0 %v1900_v3  ;;  %1340 = vmatprep.mubr.msk.f32.mxu0 %vm1901_vm1, %v1902_v11 }
  0xf5   : > { %1375 = vmatpush3.bf16.msra.mxu0 %v1374_v20 }
  0xf8   : > { %1341 = vmatmul.mubr.msk.f32.vlgmr.msra.gmra.mrb[2].mxu0 %vm494_vm0, %v482_v16 }
 0x1c3   : > { %v564_v23 = vpop.f32.mrb[0].mxu0 }
 0x1c4   : > { %v565_v24 = vadd.f32 %v1269_v21, %v564_v23  ;;  %v646_v25 = vpop.f32.mrb[0].mxu1  ;;  %v1320_v26 = vpop.f32.mrb[1].mxu0 }
 0x1c5   : > { %v647_v27 = vadd.f32 %v1271_v22, %v646_v25  ;;  %v1331_v28 = vpop.f32.mrb[1].mxu1 }
 0x1c6   : > { %v568_v29 = vmul.f32 0.35355338, %v565_v24 }
 0x1c7   : > { %733 = vst.msk [vmem:[#allocation3] sm:$0xff] %vm731_vm2, %v647_v27  ;;  %742 = vrot.lane.b32.xlu0 %v647_v27, %s1903_s5 }
 0x1c8   : > { %732 = vst.msk [vmem:[#allocation2] sm:$0xff] %vm731_vm2, %v568_v29  ;;  %753 = vrot.lane.b32.xlu1 %v568_v29, %s1904_s1 }
 0x1cb   : > { %758 = vrot.lane.b32.xlu0 %v647_v27, %s1904_s1  ;;  %v727_v31 = vpop.f32.mrb[2].mxu0 }
 0x1cc   : > { %v728_v32 = vadd.f32 %v1273_v30, %v727_v31  ;;  %v1342_v33 = vpop.f32.mrb[3].mxu0 }
 0x1ce   : > { %734 = vst.msk [vmem:[#allocation4] sm:$0xff] %vm731_vm2, %v728_v32  ;;  %748 = vrot.lane.b32.xlu1 %v728_v32, %s1903_s5 }
 0x1cf   : > { %736 = vrot.lane.b32.xlu0 %v568_v29, %s1903_s5 }
 0x1d2   : > { %763 = vrot.lane.b32.xlu1 %v728_v32, %s1904_s1 }
 0x1d3   : > { %768 = vrot.lane.b32.xlu0 %v568_v29, %s1905_s16 }
 0x1d6   : > { %773 = vrot.lane.b32.xlu1 %v647_v27, %s1905_s16 }
 0x1d7   : > { %778 = vrot.lane.b32.xlu0 %v728_v32, %s1905_s16 }
 0x239   : > { %v743_v34 = vpop.permute.xlu0 %742 }
 0x23a   : > { %746 = vst.msk [vmem:[#allocation3 + $0x8] sm:$0xff] %vm731_vm2, %v743_v34  ;;  %v754_v35 = vpop.permute.xlu1 %753 }
 0x23b   : > { %757 = vst.msk [vmem:[#allocation2 + $0x10] sm:$0xff] %vm731_vm2, %v754_v35 }
 0x23d   : > { %v759_v36 = vpop.permute.xlu0 %758 }
 0x23e   : > { %762 = vst.msk [vmem:[#allocation3 + $0x10] sm:$0xff] %vm731_vm2, %v759_v36 }
 0x240   : > { %v749_v37 = vpop.permute.xlu1 %748 }
 0x241   : > { %v737_v38 = vpop.permute.xlu0 %736  ;;  %752 = vst.msk [vmem:[#allocation4 + $0x8] sm:$0xff] %vm731_vm2, %v749_v37 }
 0x242   : > { %740 = vst.msk [vmem:[#allocation2 + $0x8] sm:$0xff] %vm731_vm2, %v737_v38 }
 0x244   : > { %v764_v39 = vpop.permute.xlu1 %763 }
 0x245   : > { %v769_v40 = vpop.permute.xlu0 %768  ;;  %767 = vst.msk [vmem:[#allocation4 + $0x10] sm:$0xff] %vm731_vm2, %v764_v39 }
 0x246   : > { %772 = vst.msk [vmem:[#allocation2 + $0x18] sm:$0xff] %vm731_vm2, %v769_v40 }
 0x248   : > { %v774_v41 = vpop.permute.xlu1 %773 }
 0x249   : > { %v779_v42 = vpop.permute.xlu0 %778  ;;  %777 = vst.msk [vmem:[#allocation3 + $0x18] sm:$0xff] %vm731_vm2, %v774_v41 }
 0x24a   : > { %782 = vst.msk [vmem:[#allocation4 + $0x18] sm:$0xff] %vm731_vm2, %v779_v42 }
 0x24b PF: > { %s2594_s12 = sld [smem:[#allocation27_spill]]  ;;  %vm791_vm3 = vcmask 64512   ;;  %v1906_v43 = vmov 0.0   ;;  %vm1907_vm4 = vmmov 0   ;;  %v954_v58 = vld [vmem:[%s431_s6] sm:$0xff]  ;;  %vm1029_vm5 = vcmask 261120  }
 0x24c   : > { %1343 = vmatprep.subr.mxu0 %v1906_v43  ;;  %1345 = vmatprep.mubr.msk.f32.mxu0 %vm1907_vm4, %v1906_v43  ;;  %v953_v61 = vld [vmem:[#allocation5] sm:$0xff] }
 0x24d   : > { %1348 = vmatprep.subr.mxu1 %v1906_v43  ;;  %1350 = vmatprep.mubr.msk.f32.mxu1 %vm1907_vm4, %v1906_v43 }
 0x251   : > { %s1275_s14 = sshll.u32 %s2594_s12, 3  ;;  %p1280_p8 = scmp.ne.s32.totalorder %s2594_s12, 3 }
 0x252   : > { %s787_s22 = scalar_lea.vmem [#allocation3], %s1275_s14  ;;  %s785_s13 = scalar_lea.vmem [#allocation2], %s1275_s14 }
 0x253   : > { %v788_v44 = vld [vmem:[%s787_s22] sm:$0xff]  ;;  %s789_s29 = scalar_lea.vmem [#allocation4], %s1275_s14  ;;  %s2595_s5 = sld [smem:[#allocation42_spill]] (!%p1280_p8) }
 0x254   : > { %1344 = vmatpush3.xpose.msk.msra.mxu0 %vm791_vm3, %v788_v44  ;;  %v786_v45 = vld [vmem:[%s785_s13] sm:$0xff] }
 0x255   : > { %v790_v54 = vld [vmem:[%s789_s29] sm:$0xff] }
 0x256   : > { %1349 = vmatpush3.msra.mxu1 %v790_v54 }
 0x257   : > { %1346 = vmatmul.mubr.msk.f32.vlgmr.msra.gmra.mrb[0].mxu0 %vm791_vm3, %v786_v45  ;;  %1353 = vmatprep.subr.mxu1 %v1906_v43 }
 0x259   : > { %v1281_v2 = vld [vmem:[%s2595_s5] ss:$0 sm:$0xff] (!%p1280_p8) }
 0x32a   : > { %v864_v46 = vpop.f32.mrb[0].mxu0 }
 0x32b   : > { %868 = vst.msk [vmem:[%s470_s27] sm:$0xff] %vm791_vm3, %v864_v46  ;;  %v1347_v47 = vpop.f32.mrb[1].mxu0  ;;  %v869_v48 = vsel %vm791_vm3, %v864_v46, -inf }
 0x32c   : > { %870 = vmax.xlane.f32.xlu0 %v869_v48 }
 0x3b9   : > { %v871_v49 = vpop.xlane.xlu0 %870 }
 0x3ba   : > { %v872_v50 = vsub.f32 %v864_v46, %v871_v49 }
 0x3bc   : > { %v873_v51 = vmul.f32 1.442695, %v872_v50 }
 0x3be   : > { %1553 = vpow2.f32 %v873_v51 }
 0x3c8   : > { %v1554_v52 = vpop.eup %1553 }
 0x3c9   : > { %v875_v53 = vsel %vm791_vm3, %v1554_v52, 0.0 }
 0x3ca   : > { %876 = vadd.xlane.f32.xlu0 %v875_v53 }
 0x457   : > { %v877_v55 = vpop.xlane.xlu0 %876 }
 0x458   : > { %1555 = vrcp.f32 %v877_v55 }
 0x462   : > { %v1556_v56 = vpop.eup %1555 }
 0x463   : > { %v879_v57 = vmul.f32 %v1556_v56, %v1554_v52 }
 0x465   : > { %1351 = vmatmul.mubr.msk.f32.vlgmr.msra.gmra.mrb[0].mxu1 %vm791_vm3, %v879_v57 }
 0x466   : > { %1354 = vmatpush3.msra.mxu1 %v954_v58  ;;  %1355 = vmatprep.mubr.msk.f32.mxu1 %vm1907_vm4, %v1906_v43 }
 0x538   : > { %v949_v59 = vpop.f32.mrb[0].mxu1 }
 0x539   : > { %v1352_v60 = vpop.f32.mrb[1].mxu1  ;;  %1356 = vmatmul.mubr.msk.f32.vlgmr.msra.gmra.mrb[2].mxu1 %vm791_vm3, %v949_v59 }
 0x609   : > { %1034 = sbr.rel (%p1280_p8) target bundleno = 1562 (0x61a), region = 84 }
 0x60c   : > { %v1024_v62 = vpop.f32.mrb[2].mxu1 }
 0x60d   : > { %v1028_v63 = vadd.f32 %v1024_v62, %v953_v61  ;;  %v1357_v0 = vpop.f32.mrb[3].mxu1 }
 0x60f   : > { %1030 = vst.msk [vmem:[#allocation5] sm:$0xff] %vm1029_vm5, %v1028_v63 }
 0x616   : > { %v1035_v1 = vld [vmem:[#allocation5] sm:$0xff] }
 0x617   : > { %v1043_v3 = vadd.f32 %v1281_v2, %v1035_v1 }
 0x619   : > { %1044 = vst.msk [vmem:[%s2535_s30] sm:$0xff] %vm1029_vm5, %v1043_v3 }
 0x61a PF: > { %s2596_s1 = sld [smem:[#allocation27_spill]]  ;;  %s2597_s28 = sld [smem:[#allocation28_spill]] }
 0x61b   : > { %s2599_s8 = sld [smem:[#allocation29_spill]]  ;;  %s1066_s12 = sshll.u32 %s470_s27, 4  ;;  %s2389_s12 = int_to_ptr.vmem [resolvable:$true] %s1066_s12 }
 0x61c   : > { %s2600_s19 = sld [smem:[#allocation43_spill]]  ;;  %s1046_s23 = scalar_lea.sflag [#allocation8], %s468_s9 }
 0x61d   : > { %s1701_s30 = scalar_lea.vmem %s2389_s12, 128 }
 0x61e   : > { %p1702_p10 = scmp.ne.s32.totalorder %s2389_s12, %s1701_s30 }
 0x620   : > { %s1284_s16 = sshll.u32 %s2596_s1, 1  ;;  %s1908_s1 = smov [#allocation15]  }
 0x621   : > { %s1062_s14 = sadd.s32 %s2597_s28, %s1284_s16  ;;  %p2602_p2 = scmp.ne.s32.totalorder %s2599_s8, 0 }
 0x622   : > { %s1285_s22 = sshll.u32 %s1062_s14, 7  ;;  %s2601_s6 = smov %s2600_s19 }
 0x623   : > { %s1064_s5 = scalar_lea.hbm %s2600_s19, %s1285_s22  ;;  %p1703_p5 = pnand %p1702_p10, %p2602_p2 }
 0x624   : > { %s1705_s4 = sshll.u32 %s1908_s1, 4  ;;  %s1706_s4 = int_to_ptr.vmem [resolvable:$false] %s1705_s4 }
 0x625   : > { %p1704_p0 = pneg %p1703_p5  ;;  %s1707_s27 = scalar_lea.vmem %s1706_s4, 256 }
 0x626   : > { %p1708_p4 = scmp.lt.s32.totalorder %s2389_s12, %s1706_s4  ;;  %p1709_p3 = scmp.lt.s32.totalorder %s1707_s27, %s1701_s30 }
 0x628   : > { %p1710_p12 = por %p1709_p3, %p1708_p4 }
 0x62a   : > { %p1711_p7 = pnand %p1710_p12, %p1704_p0 }
 0x62c   : > { %1714 = shalt.err (!%p1711_p7)
}
 0x62d   : > { %s1715_s16 = scalar_lea.hbm %s1064_s5, 128  ;;  %s1719_s14 = scalar_lea.hbm %s2601_s6, 1024 }
 0x62e   : > { %p1716_p9 = scmp.ne.s32.totalorder %s1064_s5, %s1715_s16  ;;  %p1720_p13 = scmp.lt.u32.totalorder %s1064_s5, %s2601_s6 }
 0x62f   : > { %p1721_p6 = scmp.lt.u32.totalorder %s1719_s14, %s1715_s16  ;;  %p1723_p10 = scmp.lt.u32.totalorder %s1715_s16, %s1064_s5 }
 0x630   : > { %p1717_p11 = pnand %p1716_p9, %p2602_p2 }
 0x631   : > { %p1722_p8 = por %p1721_p6, %p1720_p13 }
 0x632   : > { %p1718_p1 = pneg %p1717_p11 }
 0x633   : > { %p1724_p5 = por %p1723_p10, %p1722_p8 }
 0x635   : > { %p1725_p0 = pnand %p1724_p5, %p1718_p1 }
 0x637   : > { %1728 = shalt.err (!%p1725_p0)
}
 0x638   : > { %s2603_s30 = sld [smem:[#allocation30_spill]]  ;;  %s1286_s29 = sshll.u32 %s2597_s28, 7 }
 0x639   : > { %1392 = dma.vmem_to_hbm [thread:$0]  (%p2602_p2), %s2389_s12, 128, %s1064_s5, %s1046_s23  }
 0x63a   : > { %s2604_s19 = scalar_lea.vmem [#allocation16], %s2303_s3  ;;  %s2605_s9 = sld [smem:[#allocation44_spill]] }
 0x63b   : > { %s1079_s1 = sshll.u32 %s2604_s19, 4  ;;  %s2606_s16 = sand.u32 1, %s1867_s20   ;;  %s1080_s1 = int_to_ptr.vmem [resolvable:$true] %s1079_s1 }
 0x63c   : > { %s1051_s14 = scalar_lea.sflag [#allocation17], %s2606_s16  ;;  %s1729_s22 = scalar_lea.vmem %s1080_s1, 128 }
 0x63d   : > { %p1730_p4 = scmp.ne.s32.totalorder %s1080_s1, %s1729_s22  ;;  %s1909_s8 = smov [#allocation16]  }
 0x63e   : > { %p2607_p3 = scmp.ne.s32.totalorder %s2603_s30, 0  ;;  %s1733_s13 = sshll.u32 %s1909_s8, 4  ;;  %s1734_s13 = int_to_ptr.vmem [resolvable:$false] %s1733_s13 }
 0x63f   : > { %s1735_s23 = scalar_lea.vmem %s1734_s13, 256  ;;  %p1736_p2 = scmp.lt.s32.totalorder %s1080_s1, %s1734_s13 }
 0x640   : > { %s2418_s11 = scalar_lea.hbm %s2605_s9, %s1286_s29  ;;  %p1731_p12 = pnand %p1730_p4, %p2607_p3 }
 0x641   : > { %p1737_p9 = scmp.lt.s32.totalorder %s1735_s23, %s1729_s22 }
 0x642   : > { %p1732_p7 = pneg %p1731_p12 }
 0x643   : > { %p1738_p11 = por %p1737_p9, %p1736_p2 }
 0x645   : > { %p1739_p1 = pnand %p1738_p11, %p1732_p7 }
 0x647   : > { %1742 = shalt.err (!%p1739_p1)
}
 0x648   : > { %s1743_s3 = scalar_lea.hbm %s2418_s11, 128  ;;  %s1747_s5 = scalar_lea.hbm %s2605_s9, 256 }
 0x649   : > { %p1744_p13 = scmp.ne.s32.totalorder %s2418_s11, %s1743_s3  ;;  %p1748_p10 = scmp.lt.u32.totalorder %s2418_s11, %s2605_s9 }
 0x64a   : > { %p1749_p5 = scmp.lt.u32.totalorder %s1747_s5, %s1743_s3  ;;  %p1751_p4 = scmp.lt.u32.totalorder %s1743_s3, %s2418_s11 }
 0x64b   : > { %p1745_p6 = pnand %p1744_p13, %p2607_p3 }
 0x64c   : > { %p1750_p0 = por %p1749_p5, %p1748_p10 }
 0x64d   : > { %p1746_p8 = pneg %p1745_p6 }
 0x64e   : > { %p1752_p12 = por %p1751_p4, %p1750_p0 }
 0x650   : > { %p1753_p7 = pnand %p1752_p12, %p1746_p8 }
 0x652   : > { %1756 = shalt.err (!%p1753_p7)
}
 0x653   : > { %1393 = dma.vmem_to_hbm [thread:$0]  (%p2607_p3), %s1080_s1, 128, %s2418_s11, %s1051_s14  }
 0x654 PF: > { %s2608_s4 = sld [smem:[#allocation24_spill]]  ;;  %s2609_s27 = sld [smem:[#allocation31_spill]] }
 0x655   : > { %p1427_p2 = scmp.ge.s32.totalorder %s1891_s26, 2 }
 0x65a   : > { %s1091_s16 = sand.u32 1, %s2608_s4   ;;  %p2610_p9 = scmp.ne.s32.totalorder %s2609_s27, 0 }
 0x65b   : > { %s1092_s22 = scalar_lea.sflag [#allocation8], %s1091_s16 }
 0x65c   : > { %p1414_p11 = pnand %p1427_p2, %p2610_p9 }
 0x65e   : > { %1830 = dma.done.wait (!%p1414_p11), %s1092_s22, 128  }
 0x65f   : > { %1832 = vsyncadd (!%p1414_p11), %s1092_s22, 4294967168  ;;  %s2611_s8 = sld [smem:[#allocation26_spill]]  ;;  %s2612_s13 = sld [smem:[#allocation32_spill]] }
 0x665   : > { %s1100_s23 = sand.u32 1, %s2611_s8   ;;  %p2613_p1 = scmp.ne.s32.totalorder %s2612_s13, 0 }
 0x666   : > { %s1101_s3 = scalar_lea.sflag [#allocation17], %s1100_s23 }
 0x667   : > { %p1417_p13 = pnand %p1427_p2, %p2613_p1 }
 0x669   : > { %1834 = dma.done.wait (!%p1417_p13), %s1101_s3, 128  }
 0x66a   : > { %1836 = vsyncadd (!%p1417_p13), %s1101_s3, 4294967168  ;;  %s32_s26 = sadd.s32 1, %s1891_s26   ;;  %s2615_s13 = sld [smem:[#allocation25_spill]] }
 0x66b   : > { %p2447_p3 = scmp.ge.s32.totalorder %s32_s26, 10   ;;  %s2616_s1 = sld [smem:[#allocation33_spill]] }
 0x66c   : > { %s2617_s11 = sld [smem:[#allocation34_spill]]  ;;  %s2618_s14 = smov %s1847_s15 }
 0x66d   : > { %s2619_s15 = smov %s2253_s0  ;;  %s2620_s16 = smov %s1855_s17 }
 0x66e   : > { %s2621_s17 = smov %s1859_s18  ;;  %s2622_s18 = smov %s2242_s10 }
 0x66f   : > { %s2623_s19 = smov %s1867_s20  ;;  %s2624_s20 = smov %s1871_s21 }
 0x670   : > { %s2625_s21 = smov %s2250_s2  ;;  %s2626_s22 = smov %s1883_s24 }
 0x671   : > { %s2627_s23 = smov %s1887_s25  ;;  %s2628_s24 = smov %s2616_s1 }
 0x672   : > { %s2629_s25 = smov %s2617_s11  ;;  %31 = sbr.rel (!%p2447_p3) target bundleno = 25 (0x19), region = 161 }
 0x679   :  { %1106 = vsyncpa [#allocation7], 1 }
 0x67a   :  { %1108 = vsyncpa [#allocation7 + $0x1], 1 }
 0x67b   :  { %1109 = vsyncpa [#allocation10], 1 }
 0x67c   :  { %1110 = vsyncpa [#allocation13], 1 }
 0x67d   :  { %1111 = vsyncpa [#allocation8], 1 }
 0x67e   :  { %1113 = vsyncpa [#allocation8 + $0x1], 1 }
 0x67f   :  { %1114 = vsyncpa [#allocation17], 1 }
 0x680   :  { %1116 = vsyncpa [#allocation17 + $0x1], 1 }

// kernel: tpu_custom_call.1
= control target key start
LH: loop header
LB: loop body
LE: loop exit
PB: predicated region body
PF: predicated region fallthrough
CT: control target
= control target key end

     0   :  { %s2494_s0 = inlined_call_operand.hbm [shape: f32[2,8,32], index: 0, kind: input, shape index: {}]   ;;  %s2495_s1 = inlined_call_operand.hbm [shape: f32[32,32], index: 1, kind: input, shape index: {}]   ;;  %s2496_s2 = inlined_call_operand.vmem [shape: f32[1,32], index: 2, kind: input, shape index: {}]   ;;  %s2497_s3 = inlined_call_operand.hbm [shape: f32[32,32], index: 3, kind: input, shape index: {}]   ;;  %s2498_s4 = inlined_call_operand.vmem [shape: f32[1,32], index: 4, kind: input, shape index: {}]   ;;  %s2499_s5 = inlined_call_operand.hbm [shape: f32[32,32], index: 5, kind: input, shape index: {}]   ;;  %s2500_s6 = inlined_call_operand.vmem [shape: f32[1,32], index: 6, kind: input, shape index: {}]   ;;  %s2501_s7 = inlined_call_operand.hbm [shape: f32[32,32], index: 7, kind: input, shape index: {}]   ;;  %s2502_s8 = inlined_call_operand.vmem [shape: f32[1,32], index: 8, kind: input, shape index: {}]   ;;  %s2503_s9 = inlined_call_operand.hbm [shape: f32[4,2,8,8], index: 9, kind: output, shape index: {0}]   ;;  %s2504_s10 = inlined_call_operand.hbm [shape: f32[2,8,32], index: 10, kind: output, shape index: {1}]  }
   0x1   :  { %2536 = sst [smem:[#allocation35_spill]] %s2494_s0 }
   0x2   :  { %2537 = sst [smem:[#allocation36_spill]] %s2495_s1 }
   0x3   :  { %2538 = sst [smem:[#allocation37_spill]] %s2496_s2 }
   0x4   :  { %2539 = sst [smem:[#allocation38_spill]] %s2497_s3 }
   0x5   :  { %2540 = sst [smem:[#allocation39_spill]] %s2498_s4 }
   0x6   :  { %2541 = sst [smem:[#allocation40_spill]] %s2499_s5 }
   0x7   :  { %2542 = sst [smem:[#allocation41_spill]] %s2500_s6 }
   0x8   :  { %2543 = sst [smem:[#allocation42_spill]] %s2502_s8 }
   0x9   :  { %2544 = sst [smem:[#allocation43_spill]] %s2503_s9 }
   0xa   :  { %2545 = sst [smem:[#allocation44_spill]] %s2504_s10 }
   0xb   :  { %16 = vsyncpa [#allocation7], 0 }
   0xc   :  { %18 = vsyncpa [#allocation7 + $0x1], 0 }
   0xd   :  { %19 = vsyncpa [#allocation10], 0 }
   0xe   :  { %20 = vsyncpa [#allocation13], 0 }
   0xf   :  { %21 = vsyncpa [#allocation8], 0 }
  0x10   :  { %23 = vsyncpa [#allocation8 + $0x1], 0 }
  0x11   :  { %24 = vsyncpa [#allocation17], 0 }
  0x12   :  { %26 = vsyncpa [#allocation17 + $0x1], 0  ;;  %s1965_s13 = smov 0   ;;  %s1967_s14 = smov 0  }
  0x13   :  { %s1969_s15 = smov 0   ;;  %s1971_s16 = smov 0  }
  0x14   :  { %s1973_s17 = smov 0   ;;  %s1975_s18 = smov 0  }
  0x15   :  { %s1977_s19 = smov 0   ;;  %s1979_s20 = smov 0  }
  0x16   :  { %s1981_s21 = smov 0   ;;  %s1983_s22 = smov 0  }
  0x17   :  { %s1985_s23 = smov 0   ;;  %s1987_s24 = smov 0  }
  0x18   :  { %s1989_s25 = smov 0   ;;  %s1991_s26 = smov 0  }
  0x19 LB: > { %2546 = sst [smem:[#allocation24_spill]] %s1839_s13  ;;  %s2036_s27 = sadd.s32 4294967295, %s1891_s26   ;;  %s1891_s26 = sphi %s1991_s26, %s32_s26   ;;  %s1887_s25 = sphi %s1989_s25, %s2629_s25   ;;  %s1883_s24 = sphi %s1987_s24, %s2628_s24   ;;  %s1879_s23 = sphi %s1985_s23, %s2627_s23   ;;  %s1875_s22 = sphi %s1983_s22, %s2626_s22   ;;  %s1871_s21 = sphi %s1981_s21, %s2625_s21   ;;  %s1867_s20 = sphi %s1979_s20, %s2624_s20   ;;  %s1863_s19 = sphi %s1977_s19, %s2623_s19   ;;  %s1859_s18 = sphi %s1975_s18, %s2622_s18   ;;  %s1855_s17 = sphi %s1973_s17, %s2621_s17   ;;  %s1851_s16 = sphi %s1971_s16, %s2620_s16   ;;  %s1847_s15 = sphi %s1969_s15, %s2619_s15   ;;  %s1843_s14 = sphi %s1967_s14, %s2618_s14   ;;  %s1839_s13 = sphi %s1965_s13, %s2615_s13  }
  0x1a   : > { %2547 = sst [smem:[#allocation25_spill]] %s1843_s14  ;;  %p1251_p0 = scmp.ge.s32.totalorder %s1891_s26, 1 }
  0x1b   : > { %2548 = sst [smem:[#allocation26_spill]] %s1863_s19  ;;  %p2508_p1 = scmp.eq.s32.totalorder %s2036_s27, 0 }
  0x1c   : > { %2549 = sst [smem:[#allocation27_spill]] %s1875_s22  ;;  %p302_p2 = scmp.lt.s32.totalorder %s1891_s26, 9 }
  0x1d   : > { %2550 = sst [smem:[#allocation28_spill]] %s1879_s23  ;;  %s1893_s29 = smov [#allocation9]  }
  0x1e   : > { %p2041_p3 = pnand %p1251_p0, %p302_p2  ;;  %s314_s30 = sshll.u32 %s1893_s29, 4  ;;  %s315_s30 = int_to_ptr.vmem [resolvable:$true] %s314_s30 }
  0x1f   : > { %s2553_s1 = sld [smem:[#allocation36_spill]] }
  0x20   : > { %s2551_s28 = scalar_select %p2041_p3, 1, 0 }
  0x21   : > { %p1396_p4 = pneg %p2041_p3 }
  0x23   : > { %p2049_p5 = pnand %p1396_p4, %p2508_p1 }
  0x25   : > { %s2552_s11 = scalar_select %p2049_p5, 1, 0 }
  0x26   : > { %s1557_s9 = scalar_lea.hbm %s2553_s1, 512  ;;  %p2061_p7 = pneg %p2049_p5 }
  0x27   : > { %p1558_p6 = scmp.ne.s32.totalorder %s2553_s1, %s1557_s9  ;;  %p1564_p10 = scmp.lt.u32.totalorder %s1557_s9, %s2553_s1 }
  0x29   : > { %p1560_p8 = pnand %p2061_p7, %p1558_p6 }
  0x2b   : > { %p1561_p9 = pneg %p1560_p8 }
  0x2d   : > { %p1566_p11 = pnand %p1564_p10, %p1561_p9 }
  0x2f   : > { %1569 = shalt.err (!%p1566_p11)
}
  0x30   : > { %s1570_s10 = scalar_lea.vmem %s315_s30, 512  ;;  %p1578_p2 = scmp.lt.s32.totalorder %s315_s30, %s315_s30 }
  0x31   : > { %p1571_p12 = scmp.ne.s32.totalorder %s315_s30, %s1570_s10  ;;  %p1579_p4 = scmp.lt.s32.totalorder %s1570_s10, %s1570_s10 }
  0x33   : > { %p1573_p13 = pnand %p1571_p12, %p2061_p7  ;;  %p1580_p1 = por %p1579_p4, %p1578_p2 }
  0x35   : > { %p1574_p0 = pneg %p1573_p13 }
  0x37   : > { %p1581_p3 = pnand %p1580_p1, %p1574_p0 }
  0x39   : > { %1584 = shalt.err (!%p1581_p3)
}
  0x3a   : > { %s2513_s8 = smov 128   ;;  %s2515_s4 = smov 8  }
  0x3b   : > { %1399 = dma.hbm_to_vmem [thread:$0]  (!%p2049_p5), %s2553_s1, 512, %s315_s30, [#allocation10], %s2513_s8, %s2513_s8, %s2515_s4  }
  0x3c   : > { %s1250_s23 = sadd.s32 4294967294, %s1891_s26   ;;  %p58_p1 = scmp.ne.s32.totalorder %s1871_s21, %s1867_s20 }
  0x3d   : > { %p2510_p3 = scmp.eq.s32.totalorder %s1891_s26, 0  ;;  %p64_p6 = scmp.ne.s32.totalorder %s1867_s20, %s1863_s19 }
  0x3e   : > { %p262_p8 = scmp.ne.s32.totalorder %s1847_s15, %s1843_s14  ;;  %p263_p10 = scmp.eq.s32.totalorder %s2036_s27, 7 }
  0x3f   : > { %p2092_p9 = por %p2510_p3, %p58_p1  ;;  %p2556_p11 = scmp.eq.s32.totalorder %s2036_s27, 0 }
  0x40   : > { %p268_p13 = scmp.ne.s32.totalorder %s1843_s14, %s1839_s13  ;;  %p2105_p0 = por %p263_p10, %p262_p8 }
  0x41   : > { %p2099_p12 = por %p2556_p11, %p64_p6  ;;  %p269_p2 = scmp.eq.s32.totalorder %s1250_s23, 7 }
  0x42   : > { %s2558_s30 = scalar_select %p2105_p0, 1, 0 }
  0x43   : > { %s2557_s6 = scalar_select %p2099_p12, 1, 0 }
  0x44   : > { %2559 = sst [smem:[#allocation29_spill]] %s2558_s30  ;;  %p2109_p4 = por %p263_p10, %p58_p1 }
  0x45   : > { %p2528_p3 = scmp.lt.s32.totalorder %s1891_s26, 8  ;;  %p2114_p5 = por %p269_p2, %p268_p13 }
  0x46   : > { %s2560_s9 = scalar_select %p2109_p4, 1, 0 }
  0x47   : > { %s2562_s10 = scalar_select %p2114_p5, 1, 0 }
  0x48   : > { %2561 = sst [smem:[#allocation30_spill]] %s2560_s9  ;;  %p2118_p11 = por %p269_p2, %p64_p6 }
  0x49   : > { %2563 = sst [smem:[#allocation31_spill]] %s2562_s10  ;;  %s366_s8 = sand.u32 1, %s1891_s26  }
  0x4a   : > { %s2564_s12 = scalar_select %p2118_p11, 1, 0 }
  0x4b   : > { %s368_s4 = sand.u32 1, %s1871_s21   ;;  %s1257_s19 = sshll.u32 %s1887_s25, 7 }
  0x4c   : > { %2565 = sst [smem:[#allocation32_spill]] %s2564_s12  ;;  %s1256_s1 = sshll.u32 %s368_s4, 3 }
  0x4d   : > { %s2566_s0 = sld [smem:[#allocation35_spill]]  ;;  %s370_s9 = scalar_lea.vmem [#allocation6], %s1256_s1 }
  0x4e   : > { %s377_s22 = sshll.u32 %s370_s9, 4  ;;  %p2136_p1 = pnand %p2528_p3, %p2092_p9  ;;  %s2130_s22 = int_to_ptr.vmem [resolvable:$true] %s377_s22 }
  0x4f   : > { %s1896_s4 = smov [#allocation11]  }
  0x50   : > { %s2140_s13 = sshll.u32 %s1896_s4, 4  ;;  %p1587_p8 = pneg %p2136_p1  ;;  %s331_s13 = int_to_ptr.vmem [resolvable:$true] %s2140_s13 }
  0x53   : > { %s2128_s23 = scalar_lea.hbm %s2566_s0, %s1257_s19  ;;  %s2142_s19 = scalar_lea.sflag [#allocation7], %s366_s8 }
  0x54   : > { %s1585_s30 = scalar_lea.hbm %s2128_s23, 128  ;;  %s1590_s9 = scalar_lea.hbm %s2566_s0, 256 }
  0x55   : > { %p1586_p6 = scmp.ne.s32.totalorder %s2128_s23, %s1585_s30  ;;  %p1591_p9 = scmp.lt.u32.totalorder %s2128_s23, %s2566_s0 }
  0x56   : > { %p1592_p2 = scmp.lt.u32.totalorder %s1590_s9, %s1585_s30  ;;  %p1594_p11 = scmp.lt.u32.totalorder %s1585_s30, %s2128_s23 }
  0x57   : > { %p1588_p10 = pnand %p1587_p8, %p1586_p6 }
  0x58   : > { %p1593_p3 = por %p1592_p2, %p1591_p9 }
  0x59   : > { %p1589_p13 = pneg %p1588_p10 }
  0x5a   : > { %p1595_p5 = por %p1594_p11, %p1593_p3 }
  0x5c   : > { %p1596_p4 = pnand %p1595_p5, %p1589_p13 }
  0x5e   : > { %1599 = shalt.err (!%p1596_p4)
}
  0x5f   : > { %s1600_s8 = scalar_lea.vmem %s2130_s22, 128  ;;  %s1897_s4 = smov [#allocation6]  }
  0x60   : > { %p1601_p6 = scmp.ne.s32.totalorder %s2130_s22, %s1600_s8  ;;  %s1605_s1 = sshll.u32 %s1897_s4, 4  ;;  %s1606_s1 = int_to_ptr.vmem [resolvable:$false] %s1605_s1 }
  0x61   : > { %s1607_s14 = scalar_lea.vmem %s1606_s1, 256  ;;  %p1608_p12 = scmp.lt.s32.totalorder %s2130_s22, %s1606_s1 }
  0x62   : > { %p1603_p10 = pnand %p1601_p6, %p1587_p8  ;;  %p1609_p9 = scmp.lt.s32.totalorder %s1607_s14, %s1600_s8 }
  0x64   : > { %p1604_p0 = pneg %p1603_p10  ;;  %p1610_p2 = por %p1609_p9, %p1608_p12 }
  0x66   : > { %p1611_p3 = pnand %p1610_p2, %p1604_p0 }
  0x68   : > { %1614 = shalt.err (!%p1611_p3)
}
  0x69   : > { %1409 = dma.hbm_to_vmem [thread:$0]  (!%p2136_p1), %s2128_s23, 128, %s2130_s22, %s2142_s19  }
  0x6a   : > { %s1898_s10 = smov [#allocation12]   ;;  %s2568_s3 = sld [smem:[#allocation38_spill]] }
  0x6b   : > { %s346_s30 = sshll.u32 %s1898_s10, 4  ;;  %s347_s30 = int_to_ptr.vmem [resolvable:$true] %s346_s30 }
  0x70   : > { %s1615_s4 = scalar_lea.hbm %s2568_s3, 512 }
  0x71   : > { %p1616_p5 = scmp.ne.s32.totalorder %s2568_s3, %s1615_s4  ;;  %p1622_p4 = scmp.lt.u32.totalorder %s1615_s4, %s2568_s3 }
  0x73   : > { %p1618_p12 = pnand %p1616_p5, %p2061_p7 }
  0x75   : > { %p1619_p0 = pneg %p1618_p12 }
  0x77   : > { %p1624_p11 = pnand %p1622_p4, %p1619_p0 }
  0x79   : > { %1627 = shalt.err (!%p1624_p11)
}
  0x7a   : > { %s1628_s22 = scalar_lea.vmem %s331_s13, 512  ;;  %p1636_p6 = scmp.lt.s32.totalorder %s331_s13, %s331_s13 }
  0x7b   : > { %p1629_p1 = scmp.ne.s32.totalorder %s331_s13, %s1628_s22  ;;  %p1637_p10 = scmp.lt.s32.totalorder %s1628_s22, %s1628_s22 }
  0x7d   : > { %p1631_p8 = pnand %p1629_p1, %p2061_p7  ;;  %p1638_p9 = por %p1637_p10, %p1636_p6 }
  0x7f   : > { %p1632_p13 = pneg %p1631_p8 }
  0x81   : > { %p1639_p2 = pnand %p1638_p9, %p1632_p13 }
  0x83   : > { %1642 = shalt.err (!%p1639_p2)
}
  0x84   : > { %p2569_p3 = scmp.ne.s32.totalorder %s2552_s11, 0  ;;  %s2570_s23 = smov 8  }
  0x85   : > { %s2571_s10 = smov 128   ;;  %s2572_s5 = sld [smem:[#allocation40_spill]] }
  0x86   : > { %1402 = dma.hbm_to_vmem [thread:$0]  (!%p2569_p3), %s2568_s3, 512, %s331_s13, [#allocation10], %s2571_s10, %s2571_s10, %s2570_s23  }
  0x8b   : > { %s1643_s8 = scalar_lea.hbm %s2572_s5, 512 }
  0x8c   : > { %p1644_p5 = scmp.ne.s32.totalorder %s2572_s5, %s1643_s8  ;;  %p1650_p4 = scmp.lt.u32.totalorder %s1643_s8, %s2572_s5 }
  0x8e   : > { %p1646_p12 = pnand %p1644_p5, %p2061_p7 }
  0x90   : > { %p1647_p0 = pneg %p1646_p12 }
  0x92   : > { %p1652_p11 = pnand %p1650_p4, %p1647_p0 }
  0x94   : > { %1655 = shalt.err (!%p1652_p11)
}
  0x95   : > { %s1656_s2 = scalar_lea.vmem %s347_s30, 512  ;;  %p1664_p6 = scmp.lt.s32.totalorder %s347_s30, %s347_s30 }
  0x96   : > { %p1657_p1 = scmp.ne.s32.totalorder %s347_s30, %s1656_s2  ;;  %p1665_p10 = scmp.lt.s32.totalorder %s1656_s2, %s1656_s2 }
  0x98   : > { %p1659_p8 = pnand %p1657_p1, %p2061_p7  ;;  %p1666_p9 = por %p1665_p10, %p1664_p6 }
  0x9a   : > { %p1660_p13 = pneg %p1659_p8 }
  0x9c   : > { %p1667_p2 = pnand %p1666_p9, %p1660_p13 }
  0x9e   : > { %1670 = shalt.err (!%p1667_p2)
}
  0x9f   : > { %1405 = dma.hbm_to_vmem [thread:$0]  (!%p2569_p3), %s2572_s5, 512, %s347_s30, [#allocation13], %s2571_s10, %s2571_s10, %s2570_s23  }
  0xa0   : > { %s41_s11 = sadd.s32 1, %s1883_s24  ;;  %s203_s29 = sadd.s32 1, %s1859_s18 }
  0xa1   : > { %p42_p7 = scmp.ge.s32.totalorder %s41_s11, 4  ;;  %p210_p5 = scmp.ne.s32.totalorder %s1859_s18, %s1855_s17 }
  0xa2   : > { %p216_p12 = scmp.ne.s32.totalorder %s1855_s17, %s1851_s16  ;;  %s2574_s9 = sadd.s32 1, %s1887_s25 }
  0xa3   : > { %s2631_s11 = smov (%p42_p7, %s41_s11), 0  ;;  %s2633_s9 = smov (!%p42_p7, %s2574_s9), %s1887_s25 }
  0xa4   : > { %2573 = sst [smem:[#allocation33_spill]] %s2631_s11  ;;  %s200_s4 = ssub.s32 %s1883_s24, %s2631_s11 }
  0xa5   : > { %p2575_p0 = scmp.eq.s32.totalorder %s1891_s26, 0  ;;  %p46_p3 = scmp.ge.s32.totalorder %s2633_s9, 2 }
  0xa6   : > { %p201_p11 = scmp.eq.s32.totalorder %s200_s4, 0  ;;  %p2577_p1 = scmp.eq.s32.totalorder %s2036_s27, 0 }
  0xa7   : > { %p2228_p4 = por %p210_p5, %p2575_p0  ;;  %s252_s23 = sadd.s32 1, %s1847_s15 }
  0xa8   : > { %p2234_p8 = por %p216_p12, %p2577_p1  ;;  %s2635_s9 = smov (%p46_p3, %s2633_s9), 0 }
  0xa9   : > { %2579 = sst [smem:[#allocation34_spill]] %s2635_s9  ;;  %s48_s1 = ssub.s32 %s1887_s25, %s2635_s9 }
  0xaa   : > { %s2242_s10 = scalar_select %p201_p11, %s1859_s18, %s203_s29  }
  0xab   : > { %s386_s8 = sand.u32 1, %s1859_s18   ;;  %p49_p13 = scmp.eq.s32.totalorder %s48_s1, 0 }
  0xac   : > { %s249_s12 = sor.u32 %s200_s4, %s48_s1  ;;  %s1258_s14 = sshll.u32 %s386_s8, 3 }
  0xad   : > { %p250_p6 = scmp.eq.s32.totalorder %s249_s12, 0  ;;  %s2580_s22 = sadd.s32 1, %s1871_s21 }
  0xae   : > { %s2250_s2 = scalar_select %p49_p13, %s1871_s21, %s2580_s22  }
  0xaf   : > { %s2253_s0 = scalar_select %p250_p6, %s1847_s15, %s252_s23  }
  0xb0   : > { %s1259_s13 = sshll.u32 %s1883_s24, 7  ;;  %s388_s29 = scalar_lea.vmem [#allocation14], %s1258_s14 }
  0xb1   : > { %s2259_s11 = scalar_lea.hbm %s2501_s7, %s1259_s13  ;;  %s395_s9 = sshll.u32 %s388_s29, 4  ;;  %s2261_s9 = int_to_ptr.vmem [resolvable:$true] %s395_s9 }
  0xb2   : > { %p2581_p10 = scmp.lt.s32.totalorder %s1891_s26, 8  ;;  %s1671_s23 = scalar_lea.hbm %s2259_s11, 128 }
  0xb3   : > { %p1672_p2 = scmp.ne.s32.totalorder %s2259_s11, %s1671_s23  ;;  %s1676_s1 = scalar_lea.hbm %s2501_s7, 512 }
  0xb4   : > { %p2267_p9 = pnand %p2581_p10, %p2228_p4  ;;  %p1677_p0 = scmp.lt.u32.totalorder %s2259_s11, %s2501_s7 }
  0xb5   : > { %p1678_p4 = scmp.lt.u32.totalorder %s1676_s1, %s1671_s23  ;;  %p1680_p11 = scmp.lt.u32.totalorder %s1671_s23, %s2259_s11 }
  0xb6   : > { %p1673_p7 = pneg %p2267_p9 }
  0xb7   : > { %p1679_p3 = por %p1678_p4, %p1677_p0 }
  0xb8   : > { %p1674_p5 = pnand %p1673_p7, %p1672_p2 }
  0xb9   : > { %p1681_p1 = por %p1680_p11, %p1679_p3 }
  0xba   : > { %p1675_p12 = pneg %p1674_p5 }
  0xbc   : > { %p1682_p13 = pnand %p1681_p1, %p1675_p12 }
  0xbe   : > { %1685 = shalt.err (!%p1682_p13)
}
  0xbf   : > { %s1686_s12 = scalar_lea.vmem %s2261_s9, 128  ;;  %s1899_s14 = smov [#allocation14]  }
  0xc0   : > { %p1687_p6 = scmp.ne.s32.totalorder %s2261_s9, %s1686_s12  ;;  %s1691_s22 = sshll.u32 %s1899_s14, 4  ;;  %s1692_s22 = int_to_ptr.vmem [resolvable:$false] %s1691_s22 }
  0xc1   : > { %s1693_s13 = scalar_lea.vmem %s1692_s22, 256  ;;  %p1694_p5 = scmp.lt.s32.totalorder %s2261_s9, %s1692_s22 }
  0xc2   : > { %p1689_p10 = pnand %p1687_p6, %p1673_p7  ;;  %p1695_p0 = scmp.lt.s32.totalorder %s1693_s13, %s1686_s12 }
  0xc4   : > { %p1690_p2 = pneg %p1689_p10  ;;  %p1696_p4 = por %p1695_p0, %p1694_p5 }
  0xc6   : > { %p1697_p3 = pnand %p1696_p4, %p1690_p2 }
  0xc8   : > { %1700 = shalt.err (!%p1697_p3)
}
  0xc9   : > { %1412 = dma.hbm_to_vmem [thread:$0]  (!%p2267_p9), %s2259_s11, 128, %s2261_s9, %s2142_s19  }
  0xca   : > { %p2583_p12 = scmp.ne.s32.totalorder %s2551_s28, 0 }
  0xcb   : > { %s406_s29 = sand.u32 (!%p2583_p12), 1, %s2036_s27   ;;  %s2534_s23 = sand.u32 (!%p2583_p12), 1, %s1867_s20  }
  0xcc   : > { %404 = sbr.rel (%p2583_p12) target bundleno = 1620 (0x654), region = 56  ;;  %s2303_s3 = sshll.u32 (!%p2583_p12), %s2534_s23, 3 }
  0xcd   : > { %s407_s5 = scalar_lea.sflag (!%p2583_p12), [#allocation7], %s406_s29  ;;  %s410_s1 = scalar_lea.vmem (!%p2583_p12), [#allocation6], %s2303_s3 }
  0xce   : > { %p2584_p7 = scmp.ne.s32.totalorder (!%p2583_p12), %s2557_s6, 0 }
  0xd3   : > { %1814 = dma.done.wait (%p2584_p7), %s407_s5, 128  }
  0xd4   : > { %1816 = vsyncadd (%p2584_p7), %s407_s5, 4294967168  ;;  %p2585_p9 = scmp.eq.s32.totalorder %s2036_s27, 0 }
  0xd6   : > { %1818 = dma.done.wait (%p2585_p9), [#allocation10], 1024   ;;  %p2586_p11 = pmov %p2585_p9 }
  0xd7   : > { %p2587_p1 = pmov %p2585_p9 }
  0xd8   : > { %1820 = vsyncadd (%p2586_p11), [#allocation10], 4294966272 }
  0xd9   : > { %1822 = dma.done.wait (%p2587_p1), [#allocation13], 512   ;;  %p2588_p13 = pmov %p2587_p1 }
  0xda   : > { %s429_s28 = sand.u32 1, %s1855_s17  }
  0xdb   : > { %1824 = vsyncadd (%p2588_p13), [#allocation13], 4294966784  ;;  %s2319_s19 = sshll.u32 %s429_s28, 3 }
  0xdc   : > { %s431_s6 = scalar_lea.vmem [#allocation14], %s2319_s19 }
  0xdd   : > { %1826 = dma.done.wait (%p2234_p8), %s407_s5, 128  }
  0xde   : > { %1828 = vsyncadd (%p2234_p8), %s407_s5, 4294967168  ;;  %s2589_s11 = sld [smem:[#allocation25_spill]]  ;;  %s2535_s30 = scalar_lea.vmem [#allocation16], %s2303_s3 }
  0xdf   : > { %s2590_s8 = sld [smem:[#allocation27_spill]] }
  0xe4   : > { %s468_s9 = sand.u32 1, %s2589_s11  }
  0xe5   : > { %s2329_s4 = sshll.u32 %s468_s9, 3  ;;  %p1268_p6 = scmp.ne.s32.totalorder %s2590_s8, 0 }
  0xe6   : > { %s470_s27 = scalar_lea.vmem [#allocation15], %s2329_s4  ;;  %v483_v0 = vld [vmem:[#allocation9] sm:$0xff] (!%p1268_p6)  ;;  %v484_v1 = vld [vmem:[#allocation9 + $0x8] sm:$0xff] (!%p1268_p6)  ;;  %v1900_v3 = vmov (!%p1268_p6), 0.0|0.0   ;;  %v485_v6 = vld [vmem:[#allocation9 + $0x10] sm:$0xff] (!%p1268_p6)  ;;  %vm494_vm0 = vcmask (!%p1268_p6), 261120  }
  0xe7   : > { %481 = sbr.rel (%p1268_p6) target bundleno = 587 (0x24b), region = 80  ;;  %v569_v2 = vld [vmem:[#allocation11] sm:$0xff] (!%p1268_p6)  ;;  %1358 = vmatprep.subr.bf16.mxu0 (!%p1268_p6), %v1900_v3  ;;  %1364 = vmatprep.subr.bf16.mxu1 (!%p1268_p6), %v1900_v3  ;;  %v1359_v4 = vpack.c.bf16 (!%p1268_p6), %v484_v1, %v483_v0  ;;  %v570_v5 = vld [vmem:[#allocation11 + $0x8] sm:$0xff] (!%p1268_p6)  ;;  %v486_v7 = vld [vmem:[#allocation9 + $0x18] sm:$0xff] (!%p1268_p6)  ;;  %vm1901_vm1 = vmmov (!%p1268_p6), 0   ;;  %v1902_v11 = vmov (!%p1268_p6), 0.0  }
  0xe8   : > { %v1365_v8 = vpack.c.bf16 (!%p1268_p6), %v570_v5, %v569_v2  ;;  %v571_v9 = vld [vmem:[#allocation11 + $0x10] sm:$0xff] (!%p1268_p6)  ;;  %v572_v10 = vld [vmem:[#allocation11 + $0x18] sm:$0xff] (!%p1268_p6)  ;;  %1318 = vmatprep.mubr.msk.f32.mxu0 (!%p1268_p6), %vm1901_vm1, %v1902_v11  ;;  %1329 = vmatprep.mubr.msk.f32.mxu1 (!%p1268_p6), %vm1901_vm1, %v1902_v11  ;;  %783 = vst.msk [vmem:[#allocation5] sm:$0xff] (!%p1268_p6), %vm494_vm0, %v1902_v11  ;;  %v1362_v12 = vpack.c.bf16 (!%p1268_p6), %v486_v7, %v485_v6  ;;  %v650_v14 = vld [vmem:[#allocation12] sm:$0xff] (!%p1268_p6)  ;;  %s2591_s14 = sld [smem:[#allocation37_spill]] (!%p1268_p6)  ;;  %s2592_s29 = sld [smem:[#allocation39_spill]] (!%p1268_p6) }
  0xe9   : > { %1360 = vmatpush3.bf16.msra.mxu0 (!%p1268_p6), %v1359_v4  ;;  %v1368_v13 = vpack.c.bf16 (!%p1268_p6), %v572_v10, %v571_v9  ;;  %v651_v15 = vld [vmem:[#allocation12 + $0x8] sm:$0xff] (!%p1268_p6)  ;;  %v482_v16 = vld [vmem:[%s410_s1] sm:$0xff] (!%p1268_p6)  ;;  %vm731_vm2 = vcmask (!%p1268_p6), 64512   ;;  %s1903_s5 = smov (!%p1268_p6), 120   ;;  %s1904_s1 = smov (!%p1268_p6), 112  }
  0xea   : > { %1366 = vmatpush3.bf16.msra.mxu1 (!%p1268_p6), %v1365_v8  ;;  %1361 = vmatprep.subr.bf16.mxu0 (!%p1268_p6), %v1900_v3  ;;  %v1371_v17 = vpack.c.bf16 (!%p1268_p6), %v651_v15, %v650_v14  ;;  %v652_v18 = vld [vmem:[#allocation12 + $0x10] sm:$0xff] (!%p1268_p6)  ;;  %v653_v19 = vld [vmem:[#allocation12 + $0x18] sm:$0xff] (!%p1268_p6)  ;;  %s2593_s8 = sld [smem:[#allocation41_spill]] (!%p1268_p6)  ;;  %s1905_s16 = smov (!%p1268_p6), 104  }
  0xeb   : > { %1367 = vmatprep.subr.bf16.mxu1 (!%p1268_p6), %v1900_v3  ;;  %v1374_v20 = vpack.c.bf16 (!%p1268_p6), %v653_v19, %v652_v18 }
  0xed   : > { %1363 = vmatpush3.bf16.msra.mxu0 (!%p1268_p6), %v1362_v12 }
  0xee   : > { %1369 = vmatpush3.bf16.msra.mxu1 %v1368_v13  ;;  %1370 = vmatprep.subr.bf16.mxu0 %v1900_v3  ;;  %v1269_v21 = vld [vmem:[%s2591_s14] ss:$0 sm:$0xff] }
  0xef   : > { %v1271_v22 = vld [vmem:[%s2592_s29] ss:$0 sm:$0xff] }
  0xf0   : > { %1319 = vmatmul.mubr.msk.f32.vlgmr.msra.gmra.mrb[0].mxu0 %vm494_vm0, %v482_v16  ;;  %v1273_v30 = vld [vmem:[%s2593_s8] ss:$0 sm:$0xff] }
  0xf1   : > { %1330 = vmatmul.mubr.msk.f32.vlgmr.msra.gmra.mrb[0].mxu1 %vm494_vm0, %v482_v16  ;;  %1372 = vmatpush3.bf16.msra.mxu0 %v1371_v17 }
  0xf2   : > { %1373 = vmatprep.subr.bf16.mxu0 %v1900_v3  ;;  %1340 = vmatprep.mubr.msk.f32.mxu0 %vm1901_vm1, %v1902_v11 }
  0xf5   : > { %1375 = vmatpush3.bf16.msra.mxu0 %v1374_v20 }
  0xf8   : > { %1341 = vmatmul.mubr.msk.f32.vlgmr.msra.gmra.mrb[2].mxu0 %vm494_vm0, %v482_v16 }
 0x1c3   : > { %v564_v23 = vpop.f32.mrb[0].mxu0 }
 0x1c4   : > { %v565_v24 = vadd.f32 %v1269_v21, %v564_v23  ;;  %v646_v25 = vpop.f32.mrb[0].mxu1  ;;  %v1320_v26 = vpop.f32.mrb[1].mxu0 }
 0x1c5   : > { %v647_v27 = vadd.f32 %v1271_v22, %v646_v25  ;;  %v1331_v28 = vpop.f32.mrb[1].mxu1 }
 0x1c6   : > { %v568_v29 = vmul.f32 0.35355338, %v565_v24 }
 0x1c7   : > { %733 = vst.msk [vmem:[#allocation3] sm:$0xff] %vm731_vm2, %v647_v27  ;;  %742 = vrot.lane.b32.xlu0 %v647_v27, %s1903_s5 }
 0x1c8   : > { %732 = vst.msk [vmem:[#allocation2] sm:$0xff] %vm731_vm2, %v568_v29  ;;  %753 = vrot.lane.b32.xlu1 %v568_v29, %s1904_s1 }
 0x1cb   : > { %758 = vrot.lane.b32.xlu0 %v647_v27, %s1904_s1  ;;  %v727_v31 = vpop.f32.mrb[2].mxu0 }
 0x1cc   : > { %v728_v32 = vadd.f32 %v1273_v30, %v727_v31  ;;  %v1342_v33 = vpop.f32.mrb[3].mxu0 }
 0x1ce   : > { %734 = vst.msk [vmem:[#allocation4] sm:$0xff] %vm731_vm2, %v728_v32  ;;  %748 = vrot.lane.b32.xlu1 %v728_v32, %s1903_s5 }
 0x1cf   : > { %736 = vrot.lane.b32.xlu0 %v568_v29, %s1903_s5 }
 0x1d2   : > { %763 = vrot.lane.b32.xlu1 %v728_v32, %s1904_s1 }
 0x1d3   : > { %768 = vrot.lane.b32.xlu0 %v568_v29, %s1905_s16 }
 0x1d6   : > { %773 = vrot.lane.b32.xlu1 %v647_v27, %s1905_s16 }
 0x1d7   : > { %778 = vrot.lane.b32.xlu0 %v728_v32, %s1905_s16 }
 0x239   : > { %v743_v34 = vpop.permute.xlu0 %742 }
 0x23a   : > { %746 = vst.msk [vmem:[#allocation3 + $0x8] sm:$0xff] %vm731_vm2, %v743_v34  ;;  %v754_v35 = vpop.permute.xlu1 %753 }
 0x23b   : > { %757 = vst.msk [vmem:[#allocation2 + $0x10] sm:$0xff] %vm731_vm2, %v754_v35 }
 0x23d   : > { %v759_v36 = vpop.permute.xlu0 %758 }
 0x23e   : > { %762 = vst.msk [vmem:[#allocation3 + $0x10] sm:$0xff] %vm731_vm2, %v759_v36 }
 0x240   : > { %v749_v37 = vpop.permute.xlu1 %748 }
 0x241   : > { %v737_v38 = vpop.permute.xlu0 %736  ;;  %752 = vst.msk [vmem:[#allocation4 + $0x8] sm:$0xff] %vm731_vm2, %v749_v37 }
 0x242   : > { %740 = vst.msk [vmem:[#allocation2 + $0x8] sm:$0xff] %vm731_vm2, %v737_v38 }
 0x244   : > { %v764_v39 = vpop.permute.xlu1 %763 }
 0x245   : > { %v769_v40 = vpop.permute.xlu0 %768  ;;  %767 = vst.msk [vmem:[#allocation4 + $0x10] sm:$0xff] %vm731_vm2, %v764_v39 }
 0x246   : > { %772 = vst.msk [vmem:[#allocation2 + $0x18] sm:$0xff] %vm731_vm2, %v769_v40 }
 0x248   : > { %v774_v41 = vpop.permute.xlu1 %773 }
 0x249   : > { %v779_v42 = vpop.permute.xlu0 %778  ;;  %777 = vst.msk [vmem:[#allocation3 + $0x18] sm:$0xff] %vm731_vm2, %v774_v41 }
 0x24a   : > { %782 = vst.msk [vmem:[#allocation4 + $0x18] sm:$0xff] %vm731_vm2, %v779_v42 }
 0x24b PF: > { %s2594_s12 = sld [smem:[#allocation27_spill]]  ;;  %vm791_vm3 = vcmask 64512   ;;  %v1906_v43 = vmov 0.0   ;;  %vm1907_vm4 = vmmov 0   ;;  %v954_v58 = vld [vmem:[%s431_s6] sm:$0xff]  ;;  %vm1029_vm5 = vcmask 261120  }
 0x24c   : > { %1343 = vmatprep.subr.mxu0 %v1906_v43  ;;  %1345 = vmatprep.mubr.msk.f32.mxu0 %vm1907_vm4, %v1906_v43  ;;  %v953_v61 = vld [vmem:[#allocation5] sm:$0xff] }
 0x24d   : > { %1348 = vmatprep.subr.mxu1 %v1906_v43  ;;  %1350 = vmatprep.mubr.msk.f32.mxu1 %vm1907_vm4, %v1906_v43 }
 0x251   : > { %s1275_s14 = sshll.u32 %s2594_s12, 3  ;;  %p1280_p8 = scmp.ne.s32.totalorder %s2594_s12, 3 }
 0x252   : > { %s787_s22 = scalar_lea.vmem [#allocation3], %s1275_s14  ;;  %s785_s13 = scalar_lea.vmem [#allocation2], %s1275_s14 }
 0x253   : > { %v788_v44 = vld [vmem:[%s787_s22] sm:$0xff]  ;;  %s789_s29 = scalar_lea.vmem [#allocation4], %s1275_s14  ;;  %s2595_s5 = sld [smem:[#allocation42_spill]] (!%p1280_p8) }
 0x254   : > { %1344 = vmatpush3.xpose.msk.msra.mxu0 %vm791_vm3, %v788_v44  ;;  %v786_v45 = vld [vmem:[%s785_s13] sm:$0xff] }
 0x255   : > { %v790_v54 = vld [vmem:[%s789_s29] sm:$0xff] }
 0x256   : > { %1349 = vmatpush3.msra.mxu1 %v790_v54 }
 0x257   : > { %1346 = vmatmul.mubr.msk.f32.vlgmr.msra.gmra.mrb[0].mxu0 %vm791_vm3, %v786_v45  ;;  %1353 = vmatprep.subr.mxu1 %v1906_v43 }
 0x259   : > { %v1281_v2 = vld [vmem:[%s2595_s5] ss:$0 sm:$0xff] (!%p1280_p8) }
 0x32a   : > { %v864_v46 = vpop.f32.mrb[0].mxu0 }
 0x32b   : > { %868 = vst.msk [vmem:[%s470_s27] sm:$0xff] %vm791_vm3, %v864_v46  ;;  %v1347_v47 = vpop.f32.mrb[1].mxu0  ;;  %v869_v48 = vsel %vm791_vm3, %v864_v46, -inf }
 0x32c   : > { %870 = vmax.xlane.f32.xlu0 %v869_v48 }
 0x3b9   : > { %v871_v49 = vpop.xlane.xlu0 %870 }
 0x3ba   : > { %v872_v50 = vsub.f32 %v864_v46, %v871_v49 }
 0x3bc   : > { %v873_v51 = vmul.f32 1.442695, %v872_v50 }
 0x3be   : > { %1553 = vpow2.f32 %v873_v51 }
 0x3c8   : > { %v1554_v52 = vpop.eup %1553 }
 0x3c9   : > { %v875_v53 = vsel %vm791_vm3, %v1554_v52, 0.0 }
 0x3ca   : > { %876 = vadd.xlane.f32.xlu0 %v875_v53 }
 0x457   : > { %v877_v55 = vpop.xlane.xlu0 %876 }
 0x458   : > { %1555 = vrcp.f32 %v877_v55 }
 0x462   : > { %v1556_v56 = vpop.eup %1555 }
 0x463   : > { %v879_v57 = vmul.f32 %v1556_v56, %v1554_v52 }
 0x465   : > { %1351 = vmatmul.mubr.msk.f32.vlgmr.msra.gmra.mrb[0].mxu1 %vm791_vm3, %v879_v57 }
 0x466   : > { %1354 = vmatpush3.msra.mxu1 %v954_v58  ;;  %1355 = vmatprep.mubr.msk.f32.mxu1 %vm1907_vm4, %v1906_v43 }
 0x538   : > { %v949_v59 = vpop.f32.mrb[0].mxu1 }
 0x539   : > { %v1352_v60 = vpop.f32.mrb[1].mxu1  ;;  %1356 = vmatmul.mubr.msk.f32.vlgmr.msra.gmra.mrb[2].mxu1 %vm791_vm3, %v949_v59 }
 0x609   : > { %1034 = sbr.rel (%p1280_p8) target bundleno = 1562 (0x61a), region = 84 }
 0x60c   : > { %v1024_v62 = vpop.f32.mrb[2].mxu1 }
 0x60d   : > { %v1028_v63 = vadd.f32 %v1024_v62, %v953_v61  ;;  %v1357_v0 = vpop.f32.mrb[3].mxu1 }
 0x60f   : > { %1030 = vst.msk [vmem:[#allocation5] sm:$0xff] %vm1029_vm5, %v1028_v63 }
 0x616   : > { %v1035_v1 = vld [vmem:[#allocation5] sm:$0xff] }
 0x617   : > { %v1043_v3 = vadd.f32 %v1281_v2, %v1035_v1 }
 0x619   : > { %1044 = vst.msk [vmem:[%s2535_s30] sm:$0xff] %vm1029_vm5, %v1043_v3 }
 0x61a PF: > { %s2596_s1 = sld [smem:[#allocation27_spill]]  ;;  %s2597_s28 = sld [smem:[#allocation28_spill]] }
 0x61b   : > { %s2599_s8 = sld [smem:[#allocation29_spill]]  ;;  %s1066_s12 = sshll.u32 %s470_s27, 4  ;;  %s2389_s12 = int_to_ptr.vmem [resolvable:$true] %s1066_s12 }
 0x61c   : > { %s2600_s19 = sld [smem:[#allocation43_spill]]  ;;  %s1046_s23 = scalar_lea.sflag [#allocation8], %s468_s9 }
 0x61d   : > { %s1701_s30 = scalar_lea.vmem %s2389_s12, 128 }
 0x61e   : > { %p1702_p10 = scmp.ne.s32.totalorder %s2389_s12, %s1701_s30 }
 0x620   : > { %s1284_s16 = sshll.u32 %s2596_s1, 1  ;;  %s1908_s1 = smov [#allocation15]  }
 0x621   : > { %s1062_s14 = sadd.s32 %s2597_s28, %s1284_s16  ;;  %p2602_p2 = scmp.ne.s32.totalorder %s2599_s8, 0 }
 0x622   : > { %s1285_s22 = sshll.u32 %s1062_s14, 7  ;;  %s2601_s6 = smov %s2600_s19 }
 0x623   : > { %s1064_s5 = scalar_lea.hbm %s2600_s19, %s1285_s22  ;;  %p1703_p5 = pnand %p1702_p10, %p2602_p2 }
 0x624   : > { %s1705_s4 = sshll.u32 %s1908_s1, 4  ;;  %s1706_s4 = int_to_ptr.vmem [resolvable:$false] %s1705_s4 }
 0x625   : > { %p1704_p0 = pneg %p1703_p5  ;;  %s1707_s27 = scalar_lea.vmem %s1706_s4, 256 }
 0x626   : > { %p1708_p4 = scmp.lt.s32.totalorder %s2389_s12, %s1706_s4  ;;  %p1709_p3 = scmp.lt.s32.totalorder %s1707_s27, %s1701_s30 }
 0x628   : > { %p1710_p12 = por %p1709_p3, %p1708_p4 }
 0x62a   : > { %p1711_p7 = pnand %p1710_p12, %p1704_p0 }
 0x62c   : > { %1714 = shalt.err (!%p1711_p7)
}
 0x62d   : > { %s1715_s16 = scalar_lea.hbm %s1064_s5, 128  ;;  %s1719_s14 = scalar_lea.hbm %s2601_s6, 1024 }
 0x62e   : > { %p1716_p9 = scmp.ne.s32.totalorder %s1064_s5, %s1715_s16  ;;  %p1720_p13 = scmp.lt.u32.totalorder %s1064_s5, %s2601_s6 }
 0x62f   : > { %p1721_p6 = scmp.lt.u32.totalorder %s1719_s14, %s1715_s16  ;;  %p1723_p10 = scmp.lt.u32.totalorder %s1715_s16, %s1064_s5 }
 0x630   : > { %p1717_p11 = pnand %p1716_p9, %p2602_p2 }
 0x631   : > { %p1722_p8 = por %p1721_p6, %p1720_p13 }
 0x632   : > { %p1718_p1 = pneg %p1717_p11 }
 0x633   : > { %p1724_p5 = por %p1723_p10, %p1722_p8 }
 0x635   : > { %p1725_p0 = pnand %p1724_p5, %p1718_p1 }
 0x637   : > { %1728 = shalt.err (!%p1725_p0)
}
 0x638   : > { %s2603_s30 = sld [smem:[#allocation30_spill]]  ;;  %s1286_s29 = sshll.u32 %s2597_s28, 7 }
 0x639   : > { %1392 = dma.vmem_to_hbm [thread:$0]  (%p2602_p2), %s2389_s12, 128, %s1064_s5, %s1046_s23  }
 0x63a   : > { %s2604_s19 = scalar_lea.vmem [#allocation16], %s2303_s3  ;;  %s2605_s9 = sld [smem:[#allocation44_spill]] }
 0x63b   : > { %s1079_s1 = sshll.u32 %s2604_s19, 4  ;;  %s2606_s16 = sand.u32 1, %s1867_s20   ;;  %s1080_s1 = int_to_ptr.vmem [resolvable:$true] %s1079_s1 }
 0x63c   : > { %s1051_s14 = scalar_lea.sflag [#allocation17], %s2606_s16  ;;  %s1729_s22 = scalar_lea.vmem %s1080_s1, 128 }
 0x63d   : > { %p1730_p4 = scmp.ne.s32.totalorder %s1080_s1, %s1729_s22  ;;  %s1909_s8 = smov [#allocation16]  }
 0x63e   : > { %p2607_p3 = scmp.ne.s32.totalorder %s2603_s30, 0  ;;  %s1733_s13 = sshll.u32 %s1909_s8, 4  ;;  %s1734_s13 = int_to_ptr.vmem [resolvable:$false] %s1733_s13 }
 0x63f   : > { %s1735_s23 = scalar_lea.vmem %s1734_s13, 256  ;;  %p1736_p2 = scmp.lt.s32.totalorder %s1080_s1, %s1734_s13 }
 0x640   : > { %s2418_s11 = scalar_lea.hbm %s2605_s9, %s1286_s29  ;;  %p1731_p12 = pnand %p1730_p4, %p2607_p3 }
 0x641   : > { %p1737_p9 = scmp.lt.s32.totalorder %s1735_s23, %s1729_s22 }
 0x642   : > { %p1732_p7 = pneg %p1731_p12 }
 0x643   : > { %p1738_p11 = por %p1737_p9, %p1736_p2 }
 0x645   : > { %p1739_p1 = pnand %p1738_p11, %p1732_p7 }
 0x647   : > { %1742 = shalt.err (!%p1739_p1)
}
 0x648   : > { %s1743_s3 = scalar_lea.hbm %s2418_s11, 128  ;;  %s1747_s5 = scalar_lea.hbm %s2605_s9, 256 }
 0x649   : > { %p1744_p13 = scmp.ne.s32.totalorder %s2418_s11, %s1743_s3  ;;  %p1748_p10 = scmp.lt.u32.totalorder %s2418_s11, %s2605_s9 }
 0x64a   : > { %p1749_p5 = scmp.lt.u32.totalorder %s1747_s5, %s1743_s3  ;;  %p1751_p4 = scmp.lt.u32.totalorder %s1743_s3, %s2418_s11 }
 0x64b   : > { %p1745_p6 = pnand %p1744_p13, %p2607_p3 }
 0x64c   : > { %p1750_p0 = por %p1749_p5, %p1748_p10 }
 0x64d   : > { %p1746_p8 = pneg %p1745_p6 }
 0x64e   : > { %p1752_p12 = por %p1751_p4, %p1750_p0 }
 0x650   : > { %p1753_p7 = pnand %p1752_p12, %p1746_p8 }
 0x652   : > { %1756 = shalt.err (!%p1753_p7)
}
 0x653   : > { %1393 = dma.vmem_to_hbm [thread:$0]  (%p2607_p3), %s1080_s1, 128, %s2418_s11, %s1051_s14  }
 0x654 PF: > { %s2608_s4 = sld [smem:[#allocation24_spill]]  ;;  %s2609_s27 = sld [smem:[#allocation31_spill]] }
 0x655   : > { %p1427_p2 = scmp.ge.s32.totalorder %s1891_s26, 2 }
 0x65a   : > { %s1091_s16 = sand.u32 1, %s2608_s4   ;;  %p2610_p9 = scmp.ne.s32.totalorder %s2609_s27, 0 }
 0x65b   : > { %s1092_s22 = scalar_lea.sflag [#allocation8], %s1091_s16 }
 0x65c   : > { %p1414_p11 = pnand %p1427_p2, %p2610_p9 }
 0x65e   : > { %1830 = dma.done.wait (!%p1414_p11), %s1092_s22, 128  }
 0x65f   : > { %1832 = vsyncadd (!%p1414_p11), %s1092_s22, 4294967168  ;;  %s2611_s8 = sld [smem:[#allocation26_spill]]  ;;  %s2612_s13 = sld [smem:[#allocation32_spill]] }
 0x665   : > { %s1100_s23 = sand.u32 1, %s2611_s8   ;;  %p2613_p1 = scmp.ne.s32.totalorder %s2612_s13, 0 }
 0x666   : > { %s1101_s3 = scalar_lea.sflag [#allocation17], %s1100_s23 }
 0x667   : > { %p1417_p13 = pnand %p1427_p2, %p2613_p1 }
 0x669   : > { %1834 = dma.done.wait (!%p1417_p13), %s1101_s3, 128  }
 0x66a   : > { %1836 = vsyncadd (!%p1417_p13), %s1101_s3, 4294967168  ;;  %s32_s26 = sadd.s32 1, %s1891_s26   ;;  %s2615_s13 = sld [smem:[#allocation25_spill]] }
 0x66b   : > { %p2447_p3 = scmp.ge.s32.totalorder %s32_s26, 10   ;;  %s2616_s1 = sld [smem:[#allocation33_spill]] }
 0x66c   : > { %s2617_s11 = sld [smem:[#allocation34_spill]]  ;;  %s2618_s14 = smov %s1847_s15 }
 0x66d   : > { %s2619_s15 = smov %s2253_s0  ;;  %s2620_s16 = smov %s1855_s17 }
 0x66e   : > { %s2621_s17 = smov %s1859_s18  ;;  %s2622_s18 = smov %s2242_s10 }
 0x66f   : > { %s2623_s19 = smov %s1867_s20  ;;  %s2624_s20 = smov %s1871_s21 }
 0x670   : > { %s2625_s21 = smov %s2250_s2  ;;  %s2626_s22 = smov %s1883_s24 }
 0x671   : > { %s2627_s23 = smov %s1887_s25  ;;  %s2628_s24 = smov %s2616_s1 }
 0x672   : > { %s2629_s25 = smov %s2617_s11  ;;  %31 = sbr.rel (!%p2447_p3) target bundleno = 25 (0x19), region = 161 }
 0x679   :  { %1106 = vsyncpa [#allocation7], 1 }
 0x67a   :  { %1108 = vsyncpa [#allocation7 + $0x1], 1 }
 0x67b   :  { %1109 = vsyncpa [#allocation10], 1 }
 0x67c   :  { %1110 = vsyncpa [#allocation13], 1 }
 0x67d   :  { %1111 = vsyncpa [#allocation8], 1 }
 0x67e   :  { %1113 = vsyncpa [#allocation8 + $0x1], 1 }
 0x67f   :  { %1114 = vsyncpa [#allocation17], 1 }
 0x680   :  { %1116 = vsyncpa [#allocation17 + $0x1], 1 }

</bundles_post_ra>
